<compile_context>
chip_gen: v6e
topology: v6e:2x2x1
jax: 0.10.0
libtpu: 0.0.40
codegen_flags: <defaults>
</compile_context>

<pallas_src>
import functools

import jax
import jax.numpy as jnp
from jax.experimental import pallas as pl
from jax.experimental.pallas import tpu as pltpu

LN_EPS = 1e-5


# ----------------------------- fused forward kernel --------------------------
def _disc_kernel(patches_ref,      # (B*K, N) f32   rows=(b,cin,dy,dx), cols=(i,j)
                 bdconv_ref,       # (B*Cs, B*K) bf16  block-diag conv weight
                 convb_ref,        # (B*Cs, 1) f32
                 gammas_ref,       # (L, 1, N) f32
                 betas_ref,        # (L, 1, N) f32
                 w1s_ref,          # (L, N, N) bf16
                 b1s_ref,          # (L, 1, N) f32
                 w2s_ref,          # (L, N, N) bf16
                 b2s_ref,          # (L, 1, N) f32
                 channelw_ref,     # (1, N) f32
                 channelb_ref,     # (1, 1) f32
                 bdlocal_ref,      # (B, B*Cs) bf16  block-diag local-head weight
                 localb_ref,       # (1, 1) f32
                 bdup_ref,         # (B*K, B*Cs) bf16  block-diag upconv weight
                 upb_ref,          # (B*K, 1) f32
                 local_out_ref,    # (B, N) f32
                 channel_out_ref,  # (B*Cs, 1) f32
                 ss_out_ref,       # (1, 1) f32
                 *, num_layers, inv_n_elems):
    patches = patches_ref[...]                                   # f32, kept for L1

    # Patchify Conv2d(kernel=stride=patch) as one block-diagonal matmul
    # -> activation x of shape (B*Cs, N): rows=(batch, channel), lanes=tokens.
    x = jnp.dot(bdconv_ref[...], patches.astype(jnp.bfloat16),
                preferred_element_type=jnp.float32) + convb_ref[...]

    # MLP blocks over the token (lane) axis.  LN/GELU/residual in f32,
    # matmul operands bf16 with f32 accumulation.
    for l in range(num_layers):
        mu = jnp.mean(x, axis=-1, keepdims=True)
        var = jnp.mean(jnp.square(x - mu), axis=-1, keepdims=True)
        y = (x - mu) * jax.lax.rsqrt(var + LN_EPS)
        y = y * gammas_ref[l] + betas_ref[l]
        h = jnp.dot(y.astype(jnp.bfloat16), w1s_ref[l],
                    preferred_element_type=jnp.float32) + b1s_ref[l]
        h = jax.nn.gelu(h, approximate=True)   # TODO(synk): PyTorch default is erf-GELU
        z = jnp.dot(h.astype(jnp.bfloat16), w2s_ref[l],
                    preferred_element_type=jnp.float32) + b2s_ref[l]
        x = x + z

    x_bf = x.astype(jnp.bfloat16)

    # channel_linear: Linear(N, 1)  ->  VPU multiply + lane reduce (no MXU).
    channel_out_ref[...] = (jnp.sum(x * channelw_ref[...], axis=-1, keepdims=True)
                            + channelb_ref[...])

    # local_linear: Linear(Cs, 1) over the channel (sublane) axis, expressed as a
    # block-diagonal matmul so the output (B, N) is written lane-dense.
    local_out_ref[...] = (jnp.dot(bdlocal_ref[...], x_bf,
                                  preferred_element_type=jnp.float32)
                          + localb_ref[...])

    # ConvTranspose2d(kernel=stride=patch) in the patch domain + fused L1 reduce.
    dec = jnp.dot(bdup_ref[...], x_bf,
                  preferred_element_type=jnp.float32) + upb_ref[...]
    l1 = jnp.sum(jnp.abs(patches - dec)) * inv_n_elems
    ss_out_ref[...] = jnp.reshape(l1, (1, 1))


# --------- parameter construction (deterministic, synthetic) -----------------
def init_params(key, in_channel, channel_size, patch_size, img_size, layer):
    ph, pw = patch_size
    img_h, img_w = img_size
    h, w = img_h // ph, img_w // pw
    n = h * w
    s = 0.02
    keys = jax.random.split(key, 8 + 4 * layer)

    def nrm(k, shape):
        return s * jax.random.normal(k, shape, dtype=jnp.float32)

    params = {
        "conv_w": nrm(keys[0], (channel_size, in_channel, ph, pw)),
        "conv_b": nrm(keys[1], (channel_size,)),
        "local_w": nrm(keys[2], (channel_size, 1)),
        "local_b": nrm(keys[3], (1,)),
        "channel_w": nrm(keys[4], (n, 1)),
        "channel_b": nrm(keys[5], (1,)),
        "up_w": nrm(keys[6], (channel_size, in_channel, ph, pw)),
        "up_b": nrm(keys[7], (in_channel,)),
        "layers": [],
    }
    for li in range(layer):
        k0, k1, k2, k3 = keys[8 + 4 * li: 12 + 4 * li]
        params["layers"].append({
            "gamma": jnp.ones((n,), jnp.float32),
            "beta": jnp.zeros((n,), jnp.float32),
            "w1": nrm(k0, (n, n)),
            "b1": nrm(k1, (n,)),
            "w2": nrm(k2, (n, n)),
            "b2": nrm(k3, (n,)),
        })
    return params


def pack_params(params, batch):
    """One-time repack into kernel-ready layouts (block-diag weights, bf16 MXU operands)."""
    cs, cin, ph, pw = params["conv_w"].shape
    k = cin * ph * pw
    n = params["channel_w"].shape[0]
    eye = jnp.eye(batch, dtype=jnp.float32)

    convw = params["conv_w"].reshape(cs, k)          # (Cs, K), k = (cin, dy, dx)
    upw_t = params["up_w"].reshape(cs, k).T          # (K, Cs)
    localw_row = params["local_w"].reshape(1, cs)    # (1, Cs)
    upb_col = jnp.repeat(params["up_b"], ph * pw).reshape(k, 1)

    return {
        "bdconv": jnp.kron(eye, convw).astype(jnp.bfloat16),        # (B*Cs, B*K)
        "convb": jnp.tile(params["conv_b"].reshape(cs, 1), (batch, 1)),
        "gammas": jnp.stack([lp["gamma"] for lp in params["layers"]]).reshape(-1, 1, n),
        "betas": jnp.stack([lp["beta"] for lp in params["layers"]]).reshape(-1, 1, n),
        "w1s": jnp.stack([lp["w1"] for lp in params["layers"]]).astype(jnp.bfloat16),
        "b1s": jnp.stack([lp["b1"] for lp in params["layers"]]).reshape(-1, 1, n),
        "w2s": jnp.stack([lp["w2"] for lp in params["layers"]]).astype(jnp.bfloat16),
        "b2s": jnp.stack([lp["b2"] for lp in params["layers"]]).reshape(-1, 1, n),
        "channelw": params["channel_w"].reshape(1, n).astype(jnp.float32),
        "channelb": params["channel_b"].reshape(1, 1).astype(jnp.float32),
        "bdlocal": jnp.kron(eye, localw_row).astype(jnp.bfloat16),  # (B, B*Cs)
        "localb": params["local_b"].reshape(1, 1).astype(jnp.float32),
        "bdup": jnp.kron(eye, upw_t).astype(jnp.bfloat16),          # (B*K, B*Cs)
        "upb": jnp.tile(upb_col, (batch, 1)),                       # (B*K, 1)
    }


# --------- forward: single fused pallas_call ----------------------------------
def discriminator_forward(packed, x, *, patch_size, channel_size, num_layers):
    ph, pw = patch_size
    bsz, cin, img_h, img_w = x.shape
    h, w = img_h // ph, img_w // pw
    n = h * w
    k = cin * ph * pw
    cs = channel_size

    # Only boundary layout op: extract patches into (B*K, N),
    # rows=(b, cin, dy, dx), cols=(i, j).  Feeds the kernel's input DMA.
    patches = x.reshape(bsz, cin, h, ph, w, pw)
    patches = patches.transpose(0, 1, 3, 5, 2, 4).reshape(bsz * k, n)
    patches = patches.astype(jnp.float32)

    full = lambda shape: pl.BlockSpec(shape, lambda i, _s=shape: (0,) * len(_s))

    kernel = functools.partial(_disc_kernel, num_layers=num_layers,
                               inv_n_elems=1.0 / float(bsz * k * n))

    local_out, channel_out, ss_out = pl.pallas_call(
        kernel,
        out_shape=(
            jax.ShapeDtypeStruct((bsz, n), jnp.float32),
            jax.ShapeDtypeStruct((bsz * cs, 1), jnp.float32),
            jax.ShapeDtypeStruct((1, 1), jnp.float32),
        ),
        grid=(1,),
        in_specs=[
            full((bsz * k, n)),              # patches
            full((bsz * cs, bsz * k)),       # bdconv
            full((bsz * cs, 1)),             # convb
            full((num_layers, 1, n)),        # gammas
            full((num_layers, 1, n)),        # betas
            full((num_layers, n, n)),        # w1s
            full((num_layers, 1, n)),        # b1s
            full((num_layers, n, n)),        # w2s
            full((num_layers, 1, n)),        # b2s
            full((1, n)),                    # channelw
            full((1, 1)),                    # channelb
            full((bsz, bsz * cs)),           # bdlocal
            full((1, 1)),                    # localb
            full((bsz * k, bsz * cs)),       # bdup
            full((bsz * k, 1)),              # upb
        ],
        out_specs=(
            full((bsz, n)),
            full((bsz * cs, 1)),
            full((1, 1)),
        ),
        compiler_params=pltpu.CompilerParams(
            dimension_semantics=("arbitrary",)),
    )(patches, packed["bdconv"], packed["convb"],
      packed["gammas"], packed["betas"], packed["w1s"], packed["b1s"],
      packed["w2s"], packed["b2s"], packed["channelw"], packed["channelb"],
      packed["bdlocal"], packed["localb"], packed["bdup"], packed["upb"])

    local_pred = local_out.reshape(bsz, n, 1)
    channel_pred = channel_out.reshape(bsz, cs, 1)
    ss = ss_out[0, 0]
    return local_pred, channel_pred, ss


if __name__ == "__main__":
    # Small shapes consistent with the module: in_channel=4, channel_size=32,
    # patch_size=(4,4), img_size=(16,16) -> h=w=4, tokens N=16, 2 MLP layers.
    B, Cin, Himg, Wimg = 2, 4, 16, 16
    Cs = 32
    patch = (4, 4)
    n_layers = 2

    key = jax.random.PRNGKey(0)
    kx, kp = jax.random.split(key)
    x = jax.random.normal(kx, (B, Cin, Himg, Wimg), dtype=jnp.float32)
    params = init_params(kp, Cin, Cs, patch, (Himg, Wimg), n_layers)
    packed = pack_params(params, B)

    fwd = jax.jit(functools.partial(
        discriminator_forward, patch_size=patch, channel_size=Cs,
        num_layers=n_layers))
    local_pred, channel_pred, ss = fwd(packed, x)
    jax.block_until_ready((local_pred, channel_pred, ss))

    h, w = Himg // patch[0], Wimg // patch[1]
    assert local_pred.shape == (B, h * w, 1)
    assert channel_pred.shape == (B, Cs, 1)
    assert ss.shape == ()
    assert bool(jnp.isfinite(ss))
    print("KERNEL_OK")
</pallas_src>

<mosaic_0001>
module attributes {stable_mosaic.version = 11 : i64} {
  func.func @_disc_kernel(%arg0: i32, %arg1: memref<128x16xf32, #tpu.memory_space<vmem>>, %arg2: memref<64x128xbf16, #tpu.memory_space<vmem>>, %arg3: memref<64x1xf32, #tpu.memory_space<vmem>>, %arg4: memref<2x1x16xf32, #tpu.memory_space<vmem>>, %arg5: memref<2x1x16xf32, #tpu.memory_space<vmem>>, %arg6: memref<2x16x16xbf16, #tpu.memory_space<vmem>>, %arg7: memref<2x1x16xf32, #tpu.memory_space<vmem>>, %arg8: memref<2x16x16xbf16, #tpu.memory_space<vmem>>, %arg9: memref<2x1x16xf32, #tpu.memory_space<vmem>>, %arg10: memref<1x16xf32, #tpu.memory_space<vmem>>, %arg11: memref<1x1xf32, #tpu.memory_space<vmem>>, %arg12: memref<2x64xbf16, #tpu.memory_space<vmem>>, %arg13: memref<1x1xf32, #tpu.memory_space<vmem>>, %arg14: memref<128x64xbf16, #tpu.memory_space<vmem>>, %arg15: memref<128x1xf32, #tpu.memory_space<vmem>>, %arg16: memref<2x16xf32, #tpu.memory_space<vmem>>, %arg17: memref<64x1xf32, #tpu.memory_space<vmem>>, %arg18: memref<1x1xf32, #tpu.memory_space<vmem>>) attributes {dimension_semantics = [#tpu.dimension_semantics<arbitrary>], iteration_bounds = array<i64: 1>, scalar_prefetch = 0 : i64, scratch_operands = 0 : i64, tpu.core_type = #tpu.core_type<tc>, window_params = [{pipeline_mode = #tpu.pipeline_mode<synchronous>, transform_indices = @transform_0, window_bounds = array<i64: 128, 16>}, {pipeline_mode = #tpu.pipeline_mode<synchronous>, transform_indices = @transform_1, window_bounds = array<i64: 64, 128>}, {pipeline_mode = #tpu.pipeline_mode<synchronous>, transform_indices = @transform_2, window_bounds = array<i64: 64, 1>}, {pipeline_mode = #tpu.pipeline_mode<synchronous>, transform_indices = @transform_3, window_bounds = array<i64: 2, 1, 16>}, {pipeline_mode = #tpu.pipeline_mode<synchronous>, transform_indices = @transform_4, window_bounds = array<i64: 2, 1, 16>}, {pipeline_mode = #tpu.pipeline_mode<synchronous>, transform_indices = @transform_5, window_bounds = array<i64: 2, 16, 16>}, {pipeline_mode = #tpu.pipeline_mode<synchronous>, transform_indices = @transform_6, window_bounds = array<i64: 2, 1, 16>}, {pipeline_mode = #tpu.pipeline_mode<synchronous>, transform_indices = @transform_7, window_bounds = array<i64: 2, 16, 16>}, {pipeline_mode = #tpu.pipeline_mode<synchronous>, transform_indices = @transform_8, window_bounds = array<i64: 2, 1, 16>}, {pipeline_mode = #tpu.pipeline_mode<synchronous>, transform_indices = @transform_9, window_bounds = array<i64: 1, 16>}, {pipeline_mode = #tpu.pipeline_mode<synchronous>, transform_indices = @transform_10, window_bounds = array<i64: 1, 1>}, {pipeline_mode = #tpu.pipeline_mode<synchronous>, transform_indices = @transform_11, window_bounds = array<i64: 2, 64>}, {pipeline_mode = #tpu.pipeline_mode<synchronous>, transform_indices = @transform_12, window_bounds = array<i64: 1, 1>}, {pipeline_mode = #tpu.pipeline_mode<synchronous>, transform_indices = @transform_13, window_bounds = array<i64: 128, 64>}, {pipeline_mode = #tpu.pipeline_mode<synchronous>, transform_indices = @transform_14, window_bounds = array<i64: 128, 1>}, {pipeline_mode = #tpu.pipeline_mode<synchronous>, transform_indices = @transform_15, window_bounds = array<i64: 2, 16>}, {pipeline_mode = #tpu.pipeline_mode<synchronous>, transform_indices = @transform_16, window_bounds = array<i64: 64, 1>}, {pipeline_mode = #tpu.pipeline_mode<synchronous>, transform_indices = @transform_17, window_bounds = array<i64: 1, 1>}]} {
    %c0 = arith.constant 0 : index
    %c0_0 = arith.constant 0 : index
    %0 = vector.load %arg1[%c0, %c0_0] : memref<128x16xf32, #tpu.memory_space<vmem>>, vector<128x16xf32>
    %c0_1 = arith.constant 0 : index
    %c0_2 = arith.constant 0 : index
    %1 = vector.load %arg2[%c0_1, %c0_2] : memref<64x128xbf16, #tpu.memory_space<vmem>>, vector<64x128xbf16>
    %2 = arith.truncf %0 : vector<128x16xf32> to vector<128x16xbf16>
    %cst = arith.constant dense<0.000000e+00> : vector<64x16xf32>
    %3 = tpu.matmul %1, %2, %cst {dimension_numbers = #tpu.dot_dimension_numbers<[1], [0], [0], [1], [0, 0, 1, 1], [], []>} : vector<64x128xbf16>, vector<128x16xbf16>, vector<64x16xf32> -> vector<64x16xf32>
    %c0_3 = arith.constant 0 : index
    %c0_4 = arith.constant 0 : index
    %4 = vector.load %arg3[%c0_3, %c0_4] : memref<64x1xf32, #tpu.memory_space<vmem>>, vector<64x1xf32>
    %5 = vector.broadcast %4 : vector<64x1xf32> to vector<64x16xf32>
    %6 = arith.addf %3, %5 : vector<64x16xf32>
    %cst_5 = arith.constant dense<0.000000e+00> : vector<64xf32>
    %7 = vector.multi_reduction <add>, %6, %cst_5 [1] : vector<64x16xf32> to vector<64xf32>
    %8 = vector.shape_cast %7 : vector<64xf32> to vector<64x1xf32>
    %cst_6 = arith.constant 1.600000e+01 : f32
    %9 = vector.broadcast %cst_6 : f32 to vector<64x1xf32>
    %10 = arith.divf %8, %9 : vector<64x1xf32>
    %11 = vector.broadcast %10 : vector<64x1xf32> to vector<64x16xf32>
    %12 = arith.subf %6, %11 : vector<64x16xf32>
    %13 = arith.mulf %12, %12 : vector<64x16xf32>
    %cst_7 = arith.constant dense<0.000000e+00> : vector<64xf32>
    %14 = vector.multi_reduction <add>, %13, %cst_7 [1] : vector<64x16xf32> to vector<64xf32>
    %15 = vector.shape_cast %14 : vector<64xf32> to vector<64x1xf32>
    %cst_8 = arith.constant 1.600000e+01 : f32
    %16 = vector.broadcast %cst_8 : f32 to vector<64x1xf32>
    %17 = arith.divf %15, %16 : vector<64x1xf32>
    %18 = vector.broadcast %10 : vector<64x1xf32> to vector<64x16xf32>
    %19 = arith.subf %6, %18 : vector<64x16xf32>
    %cst_9 = arith.constant 9.99999974E-6 : f32
    %20 = vector.broadcast %cst_9 : f32 to vector<64x1xf32>
    %21 = arith.addf %17, %20 : vector<64x1xf32>
    %22 = math.rsqrt %21 : vector<64x1xf32>
    %23 = vector.broadcast %22 : vector<64x1xf32> to vector<64x16xf32>
    %24 = arith.mulf %19, %23 : vector<64x16xf32>
    %c0_10 = arith.constant 0 : index
    %c0_11 = arith.constant 0 : index
    %c0_12 = arith.constant 0 : index
    %25 = vector.load %arg4[%c0_10, %c0_11, %c0_12] : memref<2x1x16xf32, #tpu.memory_space<vmem>>, vector<1x1x16xf32>
    %26 = vector.shape_cast %25 : vector<1x1x16xf32> to vector<1x16xf32>
    %27 = vector.broadcast %26 : vector<1x16xf32> to vector<64x16xf32>
    %28 = arith.mulf %24, %27 : vector<64x16xf32>
    %c0_13 = arith.constant 0 : index
    %c0_14 = arith.constant 0 : index
    %c0_15 = arith.constant 0 : index
    %29 = vector.load %arg5[%c0_13, %c0_14, %c0_15] : memref<2x1x16xf32, #tpu.memory_space<vmem>>, vector<1x1x16xf32>
    %30 = vector.shape_cast %29 : vector<1x1x16xf32> to vector<1x16xf32>
    %31 = vector.broadcast %30 : vector<1x16xf32> to vector<64x16xf32>
    %32 = arith.addf %28, %31 : vector<64x16xf32>
    %33 = arith.truncf %32 : vector<64x16xf32> to vector<64x16xbf16>
    %c0_16 = arith.constant 0 : index
    %c0_17 = arith.constant 0 : index
    %c0_18 = arith.constant 0 : index
    %34 = vector.load %arg6[%c0_16, %c0_17, %c0_18] : memref<2x16x16xbf16, #tpu.memory_space<vmem>>, vector<1x16x16xbf16>
    %35 = vector.shape_cast %34 : vector<1x16x16xbf16> to vector<16x16xbf16>
    %cst_19 = arith.constant dense<0.000000e+00> : vector<64x16xf32>
    %36 = tpu.matmul %33, %35, %cst_19 {dimension_numbers = #tpu.dot_dimension_numbers<[1], [0], [0], [1], [0, 0, 1, 1], [], []>} : vector<64x16xbf16>, vector<16x16xbf16>, vector<64x16xf32> -> vector<64x16xf32>
    %c0_20 = arith.constant 0 : index
    %c0_21 = arith.constant 0 : index
    %c0_22 = arith.constant 0 : index
    %37 = vector.load %arg7[%c0_20, %c0_21, %c0_22] : memref<2x1x16xf32, #tpu.memory_space<vmem>>, vector<1x1x16xf32>
    %38 = vector.shape_cast %37 : vector<1x1x16xf32> to vector<1x16xf32>
    %39 = vector.broadcast %38 : vector<1x16xf32> to vector<64x16xf32>
    %40 = arith.addf %36, %39 : vector<64x16xf32>
    %41 = arith.mulf %40, %40 : vector<64x16xf32>
    %42 = arith.mulf %40, %41 : vector<64x16xf32>
    %cst_23 = arith.constant 4.471500e-02 : f32
    %43 = vector.broadcast %cst_23 : f32 to vector<64x16xf32>
    %44 = arith.mulf %43, %42 : vector<64x16xf32>
    %45 = arith.addf %40, %44 : vector<64x16xf32>
    %cst_24 = arith.constant 0.797884583 : f32
    %46 = vector.broadcast %cst_24 : f32 to vector<64x16xf32>
    %47 = arith.mulf %46, %45 : vector<64x16xf32>
    %48 = math.tanh %47 : vector<64x16xf32>
    %cst_25 = arith.constant 1.000000e+00 : f32
    %49 = vector.broadcast %cst_25 : f32 to vector<64x16xf32>
    %50 = arith.addf %49, %48 : vector<64x16xf32>
    %cst_26 = arith.constant 5.000000e-01 : f32
    %51 = vector.broadcast %cst_26 : f32 to vector<64x16xf32>
    %52 = arith.mulf %51, %50 : vector<64x16xf32>
    %53 = arith.mulf %40, %52 : vector<64x16xf32>
    %54 = arith.truncf %53 : vector<64x16xf32> to vector<64x16xbf16>
    %c0_27 = arith.constant 0 : index
    %c0_28 = arith.constant 0 : index
    %c0_29 = arith.constant 0 : index
    %55 = vector.load %arg8[%c0_27, %c0_28, %c0_29] : memref<2x16x16xbf16, #tpu.memory_space<vmem>>, vector<1x16x16xbf16>
    %56 = vector.shape_cast %55 : vector<1x16x16xbf16> to vector<16x16xbf16>
    %cst_30 = arith.constant dense<0.000000e+00> : vector<64x16xf32>
    %57 = tpu.matmul %54, %56, %cst_30 {dimension_numbers = #tpu.dot_dimension_numbers<[1], [0], [0], [1], [0, 0, 1, 1], [], []>} : vector<64x16xbf16>, vector<16x16xbf16>, vector<64x16xf32> -> vector<64x16xf32>
    %c0_31 = arith.constant 0 : index
    %c0_32 = arith.constant 0 : index
    %c0_33 = arith.constant 0 : index
    %58 = vector.load %arg9[%c0_31, %c0_32, %c0_33] : memref<2x1x16xf32, #tpu.memory_space<vmem>>, vector<1x1x16xf32>
    %59 = vector.shape_cast %58 : vector<1x1x16xf32> to vector<1x16xf32>
    %60 = vector.broadcast %59 : vector<1x16xf32> to vector<64x16xf32>
    %61 = arith.addf %57, %60 : vector<64x16xf32>
    %62 = arith.addf %6, %61 : vector<64x16xf32>
    %cst_34 = arith.constant dense<0.000000e+00> : vector<64xf32>
    %63 = vector.multi_reduction <add>, %62, %cst_34 [1] : vector<64x16xf32> to vector<64xf32>
    %64 = vector.shape_cast %63 : vector<64xf32> to vector<64x1xf32>
    %cst_35 = arith.constant 1.600000e+01 : f32
    %65 = vector.broadcast %cst_35 : f32 to vector<64x1xf32>
    %66 = arith.divf %64, %65 : vector<64x1xf32>
    %67 = vector.broadcast %66 : vector<64x1xf32> to vector<64x16xf32>
    %68 = arith.subf %62, %67 : vector<64x16xf32>
    %69 = arith.mulf %68, %68 : vector<64x16xf32>
    %cst_36 = arith.constant dense<0.000000e+00> : vector<64xf32>
    %70 = vector.multi_reduction <add>, %69, %cst_36 [1] : vector<64x16xf32> to vector<64xf32>
    %71 = vector.shape_cast %70 : vector<64xf32> to vector<64x1xf32>
    %cst_37 = arith.constant 1.600000e+01 : f32
    %72 = vector.broadcast %cst_37 : f32 to vector<64x1xf32>
    %73 = arith.divf %71, %72 : vector<64x1xf32>
    %74 = vector.broadcast %66 : vector<64x1xf32> to vector<64x16xf32>
    %75 = arith.subf %62, %74 : vector<64x16xf32>
    %cst_38 = arith.constant 9.99999974E-6 : f32
    %76 = vector.broadcast %cst_38 : f32 to vector<64x1xf32>
    %77 = arith.addf %73, %76 : vector<64x1xf32>
    %78 = math.rsqrt %77 : vector<64x1xf32>
    %79 = vector.broadcast %78 : vector<64x1xf32> to vector<64x16xf32>
    %80 = arith.mulf %75, %79 : vector<64x16xf32>
    %c1 = arith.constant 1 : index
    %c0_39 = arith.constant 0 : index
    %c0_40 = arith.constant 0 : index
    %81 = vector.load %arg4[%c1, %c0_39, %c0_40] : memref<2x1x16xf32, #tpu.memory_space<vmem>>, vector<1x1x16xf32>
    %82 = vector.shape_cast %81 : vector<1x1x16xf32> to vector<1x16xf32>
    %83 = vector.broadcast %82 : vector<1x16xf32> to vector<64x16xf32>
    %84 = arith.mulf %80, %83 : vector<64x16xf32>
    %c1_41 = arith.constant 1 : index
    %c0_42 = arith.constant 0 : index
    %c0_43 = arith.constant 0 : index
    %85 = vector.load %arg5[%c1_41, %c0_42, %c0_43] : memref<2x1x16xf32, #tpu.memory_space<vmem>>, vector<1x1x16xf32>
    %86 = vector.shape_cast %85 : vector<1x1x16xf32> to vector<1x16xf32>
    %87 = vector.broadcast %86 : vector<1x16xf32> to vector<64x16xf32>
    %88 = arith.addf %84, %87 : vector<64x16xf32>
    %89 = arith.truncf %88 : vector<64x16xf32> to vector<64x16xbf16>
    %c1_44 = arith.constant 1 : index
    %c0_45 = arith.constant 0 : index
    %c0_46 = arith.constant 0 : index
    %90 = vector.load %arg6[%c1_44, %c0_45, %c0_46] : memref<2x16x16xbf16, #tpu.memory_space<vmem>>, vector<1x16x16xbf16>
    %91 = vector.shape_cast %90 : vector<1x16x16xbf16> to vector<16x16xbf16>
    %cst_47 = arith.constant dense<0.000000e+00> : vector<64x16xf32>
    %92 = tpu.matmul %89, %91, %cst_47 {dimension_numbers = #tpu.dot_dimension_numbers<[1], [0], [0], [1], [0, 0, 1, 1], [], []>} : vector<64x16xbf16>, vector<16x16xbf16>, vector<64x16xf32> -> vector<64x16xf32>
    %c1_48 = arith.constant 1 : index
    %c0_49 = arith.constant 0 : index
    %c0_50 = arith.constant 0 : index
    %93 = vector.load %arg7[%c1_48, %c0_49, %c0_50] : memref<2x1x16xf32, #tpu.memory_space<vmem>>, vector<1x1x16xf32>
    %94 = vector.shape_cast %93 : vector<1x1x16xf32> to vector<1x16xf32>
    %95 = vector.broadcast %94 : vector<1x16xf32> to vector<64x16xf32>
    %96 = arith.addf %92, %95 : vector<64x16xf32>
    %97 = arith.mulf %96, %96 : vector<64x16xf32>
    %98 = arith.mulf %96, %97 : vector<64x16xf32>
    %cst_51 = arith.constant 4.471500e-02 : f32
    %99 = vector.broadcast %cst_51 : f32 to vector<64x16xf32>
    %100 = arith.mulf %99, %98 : vector<64x16xf32>
    %101 = arith.addf %96, %100 : vector<64x16xf32>
    %cst_52 = arith.constant 0.797884583 : f32
    %102 = vector.broadcast %cst_52 : f32 to vector<64x16xf32>
    %103 = arith.mulf %102, %101 : vector<64x16xf32>
    %104 = math.tanh %103 : vector<64x16xf32>
    %cst_53 = arith.constant 1.000000e+00 : f32
    %105 = vector.broadcast %cst_53 : f32 to vector<64x16xf32>
    %106 = arith.addf %105, %104 : vector<64x16xf32>
    %cst_54 = arith.constant 5.000000e-01 : f32
    %107 = vector.broadcast %cst_54 : f32 to vector<64x16xf32>
    %108 = arith.mulf %107, %106 : vector<64x16xf32>
    %109 = arith.mulf %96, %108 : vector<64x16xf32>
    %110 = arith.truncf %109 : vector<64x16xf32> to vector<64x16xbf16>
    %c1_55 = arith.constant 1 : index
    %c0_56 = arith.constant 0 : index
    %c0_57 = arith.constant 0 : index
    %111 = vector.load %arg8[%c1_55, %c0_56, %c0_57] : memref<2x16x16xbf16, #tpu.memory_space<vmem>>, vector<1x16x16xbf16>
    %112 = vector.shape_cast %111 : vector<1x16x16xbf16> to vector<16x16xbf16>
    %cst_58 = arith.constant dense<0.000000e+00> : vector<64x16xf32>
    %113 = tpu.matmul %110, %112, %cst_58 {dimension_numbers = #tpu.dot_dimension_numbers<[1], [0], [0], [1], [0, 0, 1, 1], [], []>} : vector<64x16xbf16>, vector<16x16xbf16>, vector<64x16xf32> -> vector<64x16xf32>
    %c1_59 = arith.constant 1 : index
    %c0_60 = arith.constant 0 : index
    %c0_61 = arith.constant 0 : index
    %114 = vector.load %arg9[%c1_59, %c0_60, %c0_61] : memref<2x1x16xf32, #tpu.memory_space<vmem>>, vector<1x1x16xf32>
    %115 = vector.shape_cast %114 : vector<1x1x16xf32> to vector<1x16xf32>
    %116 = vector.broadcast %115 : vector<1x16xf32> to vector<64x16xf32>
    %117 = arith.addf %113, %116 : vector<64x16xf32>
    %118 = arith.addf %62, %117 : vector<64x16xf32>
    %119 = arith.truncf %118 : vector<64x16xf32> to vector<64x16xbf16>
    %c0_62 = arith.constant 0 : index
    %c0_63 = arith.constant 0 : index
    %120 = vector.load %arg10[%c0_62, %c0_63] : memref<1x16xf32, #tpu.memory_space<vmem>>, vector<1x16xf32>
    %121 = vector.broadcast %120 : vector<1x16xf32> to vector<64x16xf32>
    %122 = arith.mulf %118, %121 : vector<64x16xf32>
    %cst_64 = arith.constant dense<0.000000e+00> : vector<64xf32>
    %123 = vector.multi_reduction <add>, %122, %cst_64 [1] : vector<64x16xf32> to vector<64xf32>
    %124 = vector.shape_cast %123 : vector<64xf32> to vector<64x1xf32>
    %c0_65 = arith.constant 0 : index
    %c0_66 = arith.constant 0 : index
    %125 = vector.load %arg11[%c0_65, %c0_66] : memref<1x1xf32, #tpu.memory_space<vmem>>, vector<1x1xf32>
    %126 = vector.broadcast %125 : vector<1x1xf32> to vector<64x1xf32>
    %127 = arith.addf %124, %126 : vector<64x1xf32>
    %c0_67 = arith.constant 0 : index
    %c0_68 = arith.constant 0 : index
    %128 = vector.load %arg17[%c0_67, %c0_68] : memref<64x1xf32, #tpu.memory_space<vmem>>, vector<64x1xf32>
    tpu.vector_store %arg17[%c0_67, %c0_68], %127 {strides = array<i32>} : memref<64x1xf32, #tpu.memory_space<vmem>>, vector<64x1xf32>,
    %c0_69 = arith.constant 0 : index
    %c0_70 = arith.constant 0 : index
    %129 = vector.load %arg12[%c0_69, %c0_70] : memref<2x64xbf16, #tpu.memory_space<vmem>>, vector<2x64xbf16>
    %cst_71 = arith.constant dense<0.000000e+00> : vector<2x16xf32>
    %130 = tpu.matmul %129, %119, %cst_71 {dimension_numbers = #tpu.dot_dimension_numbers<[1], [0], [0], [1], [0, 0, 1, 1], [], []>} : vector<2x64xbf16>, vector<64x16xbf16>, vector<2x16xf32> -> vector<2x16xf32>
    %c0_72 = arith.constant 0 : index
    %c0_73 = arith.constant 0 : index
    %131 = vector.load %arg13[%c0_72, %c0_73] : memref<1x1xf32, #tpu.memory_space<vmem>>, vector<1x1xf32>
    %132 = vector.broadcast %131 : vector<1x1xf32> to vector<2x16xf32>
    %133 = arith.addf %130, %132 : vector<2x16xf32>
    %c0_74 = arith.constant 0 : index
    %c0_75 = arith.constant 0 : index
    %134 = vector.load %arg16[%c0_74, %c0_75] : memref<2x16xf32, #tpu.memory_space<vmem>>, vector<2x16xf32>
    tpu.vector_store %arg16[%c0_74, %c0_75], %133 {strides = array<i32>} : memref<2x16xf32, #tpu.memory_space<vmem>>, vector<2x16xf32>,
    %c0_76 = arith.constant 0 : index
    %c0_77 = arith.constant 0 : index
    %135 = vector.load %arg14[%c0_76, %c0_77] : memref<128x64xbf16, #tpu.memory_space<vmem>>, vector<128x64xbf16>
    %cst_78 = arith.constant dense<0.000000e+00> : vector<128x16xf32>
    %136 = tpu.matmul %135, %119, %cst_78 {dimension_numbers = #tpu.dot_dimension_numbers<[1], [0], [0], [1], [0, 0, 1, 1], [], []>} : vector<128x64xbf16>, vector<64x16xbf16>, vector<128x16xf32> -> vector<128x16xf32>
    %c0_79 = arith.constant 0 : index
    %c0_80 = arith.constant 0 : index
    %137 = vector.load %arg15[%c0_79, %c0_80] : memref<128x1xf32, #tpu.memory_space<vmem>>, vector<128x1xf32>
    %138 = vector.broadcast %137 : vector<128x1xf32> to vector<128x16xf32>
    %139 = arith.addf %136, %138 : vector<128x16xf32>
    %140 = arith.subf %0, %139 : vector<128x16xf32>
    %141 = math.absf %140 : vector<128x16xf32>
    %142 = vector.shape_cast %141 : vector<128x16xf32> to vector<1x128x16xf32>
    %cst_81 = arith.constant dense<0.000000e+00> : vector<1xf32>
    %143 = vector.multi_reduction <add>, %142, %cst_81 [1, 2] : vector<1x128x16xf32> to vector<1xf32>
    %144 = vector.shape_cast %143 : vector<1xf32> to vector<1x1x1xf32>
    %145 = vector.extract %144[0, 0, 0] : f32 from vector<1x1x1xf32>
    %cst_82 = arith.constant 4.8828125E-4 : f32
    %146 = arith.mulf %145, %cst_82 : f32
    %147 = vector.broadcast %146 : f32 to vector<1x1xf32>
    %c0_83 = arith.constant 0 : index
    %c0_84 = arith.constant 0 : index
    %148 = vector.load %arg18[%c0_83, %c0_84] : memref<1x1xf32, #tpu.memory_space<vmem>>, vector<1x1xf32>
    tpu.vector_store %arg18[%c0_83, %c0_84], %147 {strides = array<i32>} : memref<1x1xf32, #tpu.memory_space<vmem>>, vector<1x1xf32>,
    return
  }
  func.func @transform_0(%arg0: i32) -> (i32, i32) {
    %c0_i32 = arith.constant 0 : i32
    %c0_i32_0 = arith.constant 0 : i32
    %c0_i32_1 = arith.constant 0 : i32
    return %c0_i32, %c0_i32_0 : i32, i32
  }
  func.func @transform_1(%arg0: i32) -> (i32, i32) {
    %c0_i32 = arith.constant 0 : i32
    %c0_i32_0 = arith.constant 0 : i32
    %c0_i32_1 = arith.constant 0 : i32
    return %c0_i32, %c0_i32_0 : i32, i32
  }
  func.func @transform_2(%arg0: i32) -> (i32, i32) {
    %c0_i32 = arith.constant 0 : i32
    %c0_i32_0 = arith.constant 0 : i32
    %c0_i32_1 = arith.constant 0 : i32
    return %c0_i32, %c0_i32_0 : i32, i32
  }
  func.func @transform_3(%arg0: i32) -> (i32, i32, i32) {
    %c0_i32 = arith.constant 0 : i32
    %c0_i32_0 = arith.constant 0 : i32
    %c0_i32_1 = arith.constant 0 : i32
    %c0_i32_2 = arith.constant 0 : i32
    return %c0_i32, %c0_i32_0, %c0_i32_1 : i32, i32, i32
  }
  func.func @transform_4(%arg0: i32) -> (i32, i32, i32) {
    %c0_i32 = arith.constant 0 : i32
    %c0_i32_0 = arith.constant 0 : i32
    %c0_i32_1 = arith.constant 0 : i32
    %c0_i32_2 = arith.constant 0 : i32
    return %c0_i32, %c0_i32_0, %c0_i32_1 : i32, i32, i32
  }
  func.func @transform_5(%arg0: i32) -> (i32, i32, i32) {
    %c0_i32 = arith.constant 0 : i32
    %c0_i32_0 = arith.constant 0 : i32
    %c0_i32_1 = arith.constant 0 : i32
    %c0_i32_2 = arith.constant 0 : i32
    return %c0_i32, %c0_i32_0, %c0_i32_1 : i32, i32, i32
  }
  func.func @transform_6(%arg0: i32) -> (i32, i32, i32) {
    %c0_i32 = arith.constant 0 : i32
    %c0_i32_0 = arith.constant 0 : i32
    %c0_i32_1 = arith.constant 0 : i32
    %c0_i32_2 = arith.constant 0 : i32
    return %c0_i32, %c0_i32_0, %c0_i32_1 : i32, i32, i32
  }
  func.func @transform_7(%arg0: i32) -> (i32, i32, i32) {
    %c0_i32 = arith.constant 0 : i32
    %c0_i32_0 = arith.constant 0 : i32
    %c0_i32_1 = arith.constant 0 : i32
    %c0_i32_2 = arith.constant 0 : i32
    return %c0_i32, %c0_i32_0, %c0_i32_1 : i32, i32, i32
  }
  func.func @transform_8(%arg0: i32) -> (i32, i32, i32) {
    %c0_i32 = arith.constant 0 : i32
    %c0_i32_0 = arith.constant 0 : i32
    %c0_i32_1 = arith.constant 0 : i32
    %c0_i32_2 = arith.constant 0 : i32
    return %c0_i32, %c0_i32_0, %c0_i32_1 : i32, i32, i32
  }
  func.func @transform_9(%arg0: i32) -> (i32, i32) {
    %c0_i32 = arith.constant 0 : i32
    %c0_i32_0 = arith.constant 0 : i32
    %c0_i32_1 = arith.constant 0 : i32
    return %c0_i32, %c0_i32_0 : i32, i32
  }
  func.func @transform_10(%arg0: i32) -> (i32, i32) {
    %c0_i32 = arith.constant 0 : i32
    %c0_i32_0 = arith.constant 0 : i32
    %c0_i32_1 = arith.constant 0 : i32
    return %c0_i32, %c0_i32_0 : i32, i32
  }
  func.func @transform_11(%arg0: i32) -> (i32, i32) {
    %c0_i32 = arith.constant 0 : i32
    %c0_i32_0 = arith.constant 0 : i32
    %c0_i32_1 = arith.constant 0 : i32
    return %c0_i32, %c0_i32_0 : i32, i32
  }
  func.func @transform_12(%arg0: i32) -> (i32, i32) {
    %c0_i32 = arith.constant 0 : i32
    %c0_i32_0 = arith.constant 0 : i32
    %c0_i32_1 = arith.constant 0 : i32
    return %c0_i32, %c0_i32_0 : i32, i32
  }
  func.func @transform_13(%arg0: i32) -> (i32, i32) {
    %c0_i32 = arith.constant 0 : i32
    %c0_i32_0 = arith.constant 0 : i32
    %c0_i32_1 = arith.constant 0 : i32
    return %c0_i32, %c0_i32_0 : i32, i32
  }
  func.func @transform_14(%arg0: i32) -> (i32, i32) {
    %c0_i32 = arith.constant 0 : i32
    %c0_i32_0 = arith.constant 0 : i32
    %c0_i32_1 = arith.constant 0 : i32
    return %c0_i32, %c0_i32_0 : i32, i32
  }
  func.func @transform_15(%arg0: i32) -> (i32, i32) {
    %c0_i32 = arith.constant 0 : i32
    %c0_i32_0 = arith.constant 0 : i32
    %c0_i32_1 = arith.constant 0 : i32
    return %c0_i32, %c0_i32_0 : i32, i32
  }
  func.func @transform_16(%arg0: i32) -> (i32, i32) {
    %c0_i32 = arith.constant 0 : i32
    %c0_i32_0 = arith.constant 0 : i32
    %c0_i32_1 = arith.constant 0 : i32
    return %c0_i32, %c0_i32_0 : i32, i32
  }
  func.func @transform_17(%arg0: i32) -> (i32, i32) {
    %c0_i32 = arith.constant 0 : i32
    %c0_i32_0 = arith.constant 0 : i32
    %c0_i32_1 = arith.constant 0 : i32
    return %c0_i32, %c0_i32_0 : i32, i32
  }
}

</mosaic_0001>

<bundles_post_ra>
// kernel: discriminator_forward.1
= control target key start
LH: loop header
LB: loop body
LE: loop exit
PB: predicated region body
PF: predicated region fallthrough
CT: control target
= control target key end

     0   :  { %s2661_s0 = inlined_call_operand.vmem [shape: f32[128,16], index: 0, kind: input, shape index: {}]   ;;  %s2662_s1 = inlined_call_operand.vmem [shape: bf16[64,128], index: 1, kind: input, shape index: {}]   ;;  %s2663_s2 = inlined_call_operand.vmem [shape: f32[64,1], index: 2, kind: input, shape index: {}]   ;;  %s2664_s3 = inlined_call_operand.vmem [shape: f32[2,1,16], index: 3, kind: input, shape index: {}]   ;;  %s2665_s4 = inlined_call_operand.vmem [shape: f32[2,1,16], index: 4, kind: input, shape index: {}]   ;;  %s2666_s5 = inlined_call_operand.vmem [shape: bf16[2,16,16], index: 5, kind: input, shape index: {}]   ;;  %s2667_s6 = inlined_call_operand.vmem [shape: f32[2,1,16], index: 6, kind: input, shape index: {}]   ;;  %s2668_s7 = inlined_call_operand.vmem [shape: bf16[2,16,16], index: 7, kind: input, shape index: {}]   ;;  %s2669_s8 = inlined_call_operand.vmem [shape: f32[2,1,16], index: 8, kind: input, shape index: {}]   ;;  %s2670_s9 = inlined_call_operand.vmem [shape: f32[1,16], index: 9, kind: input, shape index: {}]   ;;  %s2671_s10 = inlined_call_operand.<no memory space> [shape: f32[1,1], index: 10, kind: input, shape index: {}]   ;;  %s2672_s11 = inlined_call_operand.vmem [shape: bf16[2,64], index: 11, kind: input, shape index: {}]   ;;  %s2673_s13 = inlined_call_operand.vmem [shape: bf16[128,64], index: 13, kind: input, shape index: {}]   ;;  %s2674_s14 = inlined_call_operand.vmem [shape: f32[128,1], index: 14, kind: input, shape index: {}]   ;;  %s2675_s15 = inlined_call_operand.hbm [shape: f32[2,16], index: 15, kind: output, shape index: {0}]   ;;  %s2676_s16 = inlined_call_operand.vmem [shape: f32[64,1], index: 16, kind: output, shape index: {1}]   ;;  %s2677_s17 = inlined_call_operand.hbm [shape: f32[1,1], index: 17, kind: output, shape index: {2}]   ;;  %s2678_s12 = inlined_call_operand.<no memory space> [shape: f32[1,1], index: 12, kind: input, shape index: {}]  }
   0x1   :  { %2681 = sst [smem:[#allocation10_spill]] %s2661_s0  ;;  %v23_v0 = vstv %s2671_s10  ;;  %v25_v1 = vstv %s2678_s12 }
   0x2   :  { %2682 = sst [smem:[#allocation11_spill]] %s2662_s1  ;;  %24 = vst [vmem:[#allocation2] sm:$0x1] %v23_v0  ;;  %26 = vst [vmem:[#allocation3] sm:$0x1] %v25_v1 }
   0x3   :  { %27 = vsyncpa [#allocation5], 0  ;;  %s2683_s0 = sld [smem:[#allocation10_spill]]  ;;  %v1912_v7 = vmov 0   ;;  %v92_v16 = vld [vmem:[%s2663_s2] sm:$0xff]  ;;  %v94_v17 = vld [vmem:[%s2663_s2 + $0x10] sm:$0xff] }
   0x4   :  { %1770 = vset.pattern.permute.xlu0 %v1912_v7  ;;  %1771 = vset.pattern.permute.xlu1 %v1912_v7  ;;  %s2684_s30 = sld [smem:[#allocation11_spill]]  ;;  %v93_v20 = vld [vmem:[%s2663_s2 + $0x8] sm:$0xff]  ;;  %v95_v21 = vld [vmem:[%s2663_s2 + $0x18] sm:$0xff]  ;;  %v96_v25 = vld [vmem:[%s2663_s2 + $0x20] sm:$0xff] }
   0x5   :  { %102 = vperm.xlu0 %1770, %v92_v16   ;;  %112 = vperm.xlu1 %1771, %v94_v17   ;;  %v97_v26 = vld [vmem:[%s2663_s2 + $0x28] sm:$0xff]  ;;  %v98_v30 = vld [vmem:[%s2663_s2 + $0x30] sm:$0xff]  ;;  %v99_v31 = vld [vmem:[%s2663_s2 + $0x38] sm:$0xff] }
   0x9   :  { %v74_v2 = vld [vmem:[%s2683_s0 + $0x70] sm:$0xff]  ;;  %v75_v3 = vld [vmem:[%s2683_s0 + $0x78] sm:$0xff]  ;;  %v72_v4 = vld [vmem:[%s2683_s0 + $0x60] sm:$0xff]  ;;  %107 = vperm.xlu0 %1770, %v93_v20   ;;  %117 = vperm.xlu1 %1771, %v95_v21  }
   0xa   :  { %v91_v5 = vpack.c.bf16 %v75_v3, %v74_v2  ;;  %v73_v6 = vld [vmem:[%s2683_s0 + $0x68] sm:$0xff]  ;;  %v70_v9 = vld [vmem:[%s2683_s0 + $0x50] sm:$0xff]  ;;  %v71_v10 = vld [vmem:[%s2683_s0 + $0x58] sm:$0xff] }
   0xb   :  { %v90_v8 = vpack.c.bf16 %v73_v6, %v72_v4  ;;  %v68_v11 = vld [vmem:[%s2683_s0 + $0x40] sm:$0xff]  ;;  %v89_v12 = vpack.c.bf16 %v71_v10, %v70_v9  ;;  %v69_v13 = vld [vmem:[%s2683_s0 + $0x48] sm:$0xff]  ;;  %v66_v18 = vld [vmem:[%s2683_s0 + $0x30] sm:$0xff] }
   0xc   :  { %1663 = vmatprep.subr.bf16.mxu0 %v91_v5  ;;  %v1772_v14 = vld [vmem:[%s2684_s30] sm:$0xff]   ;;  %v88_v15 = vpack.c.bf16 %v69_v13, %v68_v11  ;;  %v67_v19 = vld [vmem:[%s2683_s0 + $0x38] sm:$0xff]  ;;  %v65_v23 = vld [vmem:[%s2683_s0 + $0x28] sm:$0xff] }
   0xd   :  { %1664 = vmatpush3.bf16.msra.mxu0 %v91_v5  ;;  %1679 = vmatprep.mubr.bf16.mxu0 %v1772_v14  ;;  %v64_v22 = vld [vmem:[%s2683_s0 + $0x20] sm:$0xff]  ;;  %v87_v24 = vpack.c.bf16 %v67_v19, %v66_v18  ;;  %v62_v27 = vld [vmem:[%s2683_s0 + $0x10] sm:$0xff]  ;;  %v63_v28 = vld [vmem:[%s2683_s0 + $0x18] sm:$0xff] }
   0xe   :  { %1665 = vmatprep.subr.bf16.mxu0 %v90_v8  ;;  %v86_v29 = vpack.c.bf16 %v65_v23, %v64_v22  ;;  %122 = vperm.xlu0 %1770, %v96_v25  }
   0xf   :  { %127 = vperm.xlu1 %1771, %v97_v26  }
  0x11   :  { %1666 = vmatpush3.bf16.msra.mxu0 %v90_v8 }
  0x12   :  { %1667 = vmatprep.subr.bf16.mxu0 %v89_v12 }
  0x15   :  { %1668 = vmatpush3.bf16.msra.mxu0 %v89_v12 }
  0x16   :  { %1669 = vmatprep.subr.bf16.mxu0 %v88_v15 }
  0x19   :  { %1670 = vmatpush3.bf16.msra.mxu0 %v88_v15 }
  0x1a   :  { %1671 = vmatprep.subr.bf16.mxu0 %v87_v24 }
  0x1d   :  { %1672 = vmatpush3.bf16.msra.mxu0 %v87_v24 }
  0x1e   :  { %28 = vsyncpa [#allocation7], 0  ;;  %1673 = vmatprep.subr.bf16.mxu0 %v86_v29  ;;  %v85_v32 = vpack.c.bf16 %v63_v28, %v62_v27  ;;  %v60_v33 = vld [vmem:[%s2683_s0] sm:$0xff]  ;;  %v61_v34 = vld [vmem:[%s2683_s0 + $0x8] sm:$0xff]  ;;  %132 = vperm.xlu0 %1770, %v98_v30   ;;  %vm229_vm0 = vcmask 130048   ;;  %vm1127_vm1 = vcmask 523264  }
  0x1f   :  { %137 = vperm.xlu1 %1771, %v99_v31   ;;  %v84_v35 = vpack.c.bf16 %v61_v34, %v60_v33  ;;  %v1773_v36 = vld [vmem:[%s2684_s30 + $0x8] sm:$0xff]   ;;  %v1774_v37 = vld [vmem:[%s2684_s30 + $0x10] sm:$0xff]   ;;  %v1775_v38 = vld [vmem:[%s2684_s30 + $0x18] sm:$0xff]   ;;  %vm1914_vm2 = vmmov 0   ;;  %vm1107_vm3 = vcmask 7168   ;;  %s1915_s18 = smov [#allocation4]  }
  0x20   :  { %s1528_s19 = sshll.u32 %s1915_s18, 4  ;;  %vm1171_vm4 = vcmask 123904   ;;  %s1529_s19 = int_to_ptr.vmem [resolvable:$true] %s1528_s19 }
  0x21   :  { %1674 = vmatpush3.bf16.msra.mxu0 %v86_v29  ;;  %p1873_p1 = scmp.lt.s32.totalorder %s1529_s19, %s1529_s19 }
  0x22   :  { %1675 = vmatprep.subr.bf16.mxu0 %v85_v32 }
  0x25   :  { %1676 = vmatpush3.bf16.msra.mxu0 %v85_v32 }
  0x26   :  { %1677 = vmatprep.subr.bf16.mxu0 %v84_v35 }
  0x29   :  { %1678 = vmatpush3.bf16.msra.mxu0 %v84_v35 }
  0x2c   :  { %1680 = vmatmul.mubr.bf16.vlgmr.msra.gmra.mxu0 %v1773_v36 }
  0x2d   :  { %1683 = vmatprep.mubr.bf16.mxu0 %v1774_v37 }
  0x34   :  { %1684 = vmatmul.mubr.bf16.gmra.mxu0 %v1775_v38 }
  0x80   :  { %v103_v39 = vpop.permute.xlu0 %102  ;;  %v113_v40 = vpop.permute.xlu1 %112 }
  0x84   :  { %v108_v41 = vpop.permute.xlu0 %107  ;;  %v118_v45 = vpop.permute.xlu1 %117 }
  0x89   :  { %v123_v49 = vpop.permute.xlu0 %122 }
  0x8a   :  { %v128_v56 = vpop.permute.xlu1 %127 }
  0x99   :  { %v133_v59 = vpop.permute.xlu0 %132 }
  0x9a   :  { %v138_v2 = vpop.permute.xlu1 %137 }
  0xec   :  { %v1681_v42 = vpop.f32.mrf.mxu0 }
  0xed   :  { %v2099_v47 = vadd.f32 %v1681_v42, %v113_v40 }
  0xee   :  { %v198_v43 = vpop.f32.mrf.mxu0 }
  0xef   :  { %v2097_v44 = vadd.f32 %v198_v43, %v103_v39  ;;  %v236_v55 = vsel %vm229_vm0, %v2099_v47, 0.0 }
  0xf0   :  { %v1682_v46 = vpop.f32.mrf.mxu0 }
  0xf1   :  { %v230_v48 = vsel %vm229_vm0, %v2097_v44, 0.0  ;;  %v2105_v53 = vadd.f32 %v1682_v46, %v118_v45 }
  0xf2   :  { %v201_v50 = vpop.f32.mrf.mxu0  ;;  %231 = vadd.xlane.f32.xlu0 %v230_v48 }
  0xf3   :  { %v2103_v51 = vadd.f32 %v201_v50, %v108_v41  ;;  %v239_v63 = vsel %vm229_vm0, %v2105_v53, 0.0 }
  0xf4   :  { %v1685_v52 = vpop.f32.mrf.mxu0 }
  0xf5   :  { %v233_v54 = vsel %vm229_vm0, %v2103_v51, 0.0  ;;  %v2113_v61 = vadd.f32 %v1685_v52, %v133_v59 }
  0xf6   :  { %v214_v57 = vpop.f32.mrf.mxu0  ;;  %234 = vadd.xlane.f32.xlu1 %v233_v54  ;;  %237 = vadd.xlane.f32.xlu0 %v236_v55 }
  0xf7   :  { %v2111_v58 = vadd.f32 %v214_v57, %v123_v49  ;;  %v248_v4 = vsel %vm229_vm0, %v2113_v61, 0.0  ;;  %v1776_v49 = vld [vmem:[%s2666_s5] sm:$0xff]  }
  0xf8   :  { %v1686_v60 = vpop.f32.mrf.mxu0  ;;  %1687 = vmatprep.subr.bf16.mxu1 %v1776_v49 }
  0xf9   :  { %v242_v62 = vsel %vm229_vm0, %v2111_v58, 0.0  ;;  %v2121_v3 = vadd.f32 %v1686_v60, %v138_v2  ;;  %1688 = vmatpush3.bf16.msra.mxu1 %v1776_v49 }
  0xfa   :  { %v217_v0 = vpop.f32.mrf.mxu0  ;;  %243 = vadd.xlane.f32.xlu1 %v242_v62  ;;  %240 = vadd.xlane.f32.xlu0 %v239_v63 }
  0xfb   :  { %v2119_v1 = vadd.f32 %v217_v0, %v128_v56  ;;  %v251_v6 = vsel %vm229_vm0, %v2121_v3, 0.0 }
  0xfd   :  { %v245_v5 = vsel %vm229_vm0, %v2119_v1, 0.0 }
  0xfe   :  { %249 = vadd.xlane.f32.xlu1 %v248_v4  ;;  %246 = vadd.xlane.f32.xlu0 %v245_v5 }
 0x102   :  { %252 = vadd.xlane.f32.xlu0 %v251_v6 }
 0x17b   :  { %v232_v7 = vpop.xlane.xlu0 %231 }
 0x17c   :  { %v255_v8 = vmul.f32 0.0625, %v232_v7 }
 0x17e   :  { %v2130_v9 = vsub.f32 %v2097_v44, %v255_v8 }
 0x17f   :  { %v235_v10 = vpop.xlane.xlu1 %234  ;;  %v238_v11 = vpop.xlane.xlu0 %237 }
 0x180   :  { %v256_v12 = vmul.f32 0.0625, %v235_v10  ;;  %v257_v13 = vmul.f32 0.0625, %v238_v11  ;;  %v271_v14 = vmul.f32 %v2130_v9, %v2130_v9 }
 0x182   :  { %v2135_v15 = vsub.f32 %v2103_v51, %v256_v12  ;;  %v2138_v16 = vsub.f32 %v2099_v47, %v257_v13  ;;  %v279_v17 = vsel %vm229_vm0, %v271_v14, 0.0 }
 0x183   :  { %v244_v18 = vpop.xlane.xlu1 %243  ;;  %280 = vadd.xlane.f32.xlu1 %v279_v17  ;;  %v241_v19 = vpop.xlane.xlu0 %240 }
 0x184   :  { %v259_v20 = vmul.f32 0.0625, %v244_v18  ;;  %v258_v21 = vmul.f32 0.0625, %v241_v19  ;;  %v272_v22 = vmul.f32 %v2135_v15, %v2135_v15  ;;  %v273_v23 = vmul.f32 %v2138_v16, %v2138_v16 }
 0x186   :  { %v2146_v24 = vsub.f32 %v2111_v58, %v259_v20  ;;  %v2149_v25 = vsub.f32 %v2105_v53, %v258_v21  ;;  %v282_v26 = vsel %vm229_vm0, %v272_v22, 0.0  ;;  %v285_v27 = vsel %vm229_vm0, %v273_v23, 0.0  ;;  %v1558_v21 = vld [vmem:[%s2664_s3] ss:$0 sm:$0xff] }
 0x187   :  { %v250_v28 = vpop.xlane.xlu1 %249  ;;  %283 = vadd.xlane.f32.xlu0 %v282_v26  ;;  %286 = vadd.xlane.f32.xlu1 %v285_v27  ;;  %v247_v29 = vpop.xlane.xlu0 %246 }
 0x188   :  { %v261_v30 = vmul.f32 0.0625, %v250_v28  ;;  %v260_v31 = vmul.f32 0.0625, %v247_v29  ;;  %v275_v32 = vmul.f32 %v2146_v24, %v2146_v24  ;;  %v274_v33 = vmul.f32 %v2149_v25, %v2149_v25  ;;  %v1559_v28 = vld [vmem:[%s2665_s4] ss:$0 sm:$0xff] }
 0x18a   :  { %v2158_v34 = vsub.f32 %v2113_v61, %v261_v30  ;;  %v2161_v35 = vsub.f32 %v2119_v1, %v260_v31  ;;  %v291_v36 = vsel %vm229_vm0, %v275_v32, 0.0  ;;  %v288_v37 = vsel %vm229_vm0, %v274_v33, 0.0 }
 0x18b   :  { %292 = vadd.xlane.f32.xlu1 %v291_v36  ;;  %289 = vadd.xlane.f32.xlu0 %v288_v37  ;;  %v253_v38 = vpop.xlane.xlu0 %252 }
 0x18c   :  { %v262_v39 = vmul.f32 0.0625, %v253_v38  ;;  %v277_v40 = vmul.f32 %v2158_v34, %v2158_v34  ;;  %v276_v41 = vmul.f32 %v2161_v35, %v2161_v35 }
 0x18e   :  { %v2170_v42 = vsub.f32 %v2121_v3, %v262_v39  ;;  %v297_v43 = vsel %vm229_vm0, %v277_v40, 0.0  ;;  %v294_v45 = vsel %vm229_vm0, %v276_v41, 0.0 }
 0x18f   :  { %298 = vadd.xlane.f32.xlu1 %v297_v43  ;;  %295 = vadd.xlane.f32.xlu0 %v294_v45 }
 0x190   :  { %v278_v46 = vmul.f32 %v2170_v42, %v2170_v42 }
 0x192   :  { %v300_v48 = vsel %vm229_vm0, %v278_v46, 0.0 }
 0x193   :  { %301 = vadd.xlane.f32.xlu0 %v300_v48 }
 0x20c   :  { %v281_v50 = vpop.xlane.xlu1 %280 }
 0x20d   :  { %v303_v52 = vmul.f32 0.0625, %v281_v50 }
 0x20f   :  { %v311_v54 = vadd.f32 1e-05, %v303_v52 }
 0x210   :  { %v287_v55 = vpop.xlane.xlu1 %286  ;;  %v284_v56 = vpop.xlane.xlu0 %283 }
 0x211   :  { %1788 = vrsqrt.f32 %v311_v54  ;;  %v305_v57 = vmul.f32 0.0625, %v287_v55  ;;  %v304_v59 = vmul.f32 0.0625, %v284_v56 }
 0x213   :  { %v313_v60 = vadd.f32 1e-05, %v305_v57  ;;  %v312_v62 = vadd.f32 1e-05, %v304_v59 }
 0x214   :  { %v293_v63 = vpop.xlane.xlu1 %292  ;;  %v290_v0 = vpop.xlane.xlu0 %289 }
 0x215   :  { %1790 = vrsqrt.f32 %v313_v60  ;;  %v307_v2 = vmul.f32 0.0625, %v293_v63  ;;  %v306_v4 = vmul.f32 0.0625, %v290_v0 }
 0x216   :  { %1792 = vrsqrt.f32 %v312_v62 }
 0x217   :  { %v315_v5 = vadd.f32 1e-05, %v307_v2  ;;  %v314_v6 = vadd.f32 1e-05, %v306_v4 }
 0x218   :  { %v299_v7 = vpop.xlane.xlu1 %298  ;;  %v296_v8 = vpop.xlane.xlu0 %295 }
 0x219   :  { %1794 = vrsqrt.f32 %v315_v5  ;;  %v309_v10 = vmul.f32 0.0625, %v299_v7  ;;  %v308_v11 = vmul.f32 0.0625, %v296_v8 }
 0x21a   :  { %1796 = vrsqrt.f32 %v314_v6 }
 0x21b   :  { %v317_v12 = vadd.f32 1e-05, %v309_v10  ;;  %v316_v13 = vadd.f32 1e-05, %v308_v11 }
 0x21c   :  { %v302_v14 = vpop.xlane.xlu0 %301 }
 0x21d   :  { %1798 = vrsqrt.f32 %v317_v12  ;;  %v310_v17 = vmul.f32 0.0625, %v302_v14 }
 0x21e   :  { %v1789_v18 = vpop.eup %1788  ;;  %1800 = vrsqrt.f32 %v316_v13 }
 0x21f   :  { %v318_v19 = vadd.f32 1e-05, %v310_v17  ;;  %v327_v20 = vmul.f32 %v1789_v18, %v2130_v9 }
 0x221   :  { %1802 = vrsqrt.f32 %v318_v19  ;;  %v342_v26 = vmul.f32 %v1558_v21, %v327_v20 }
 0x222   :  { %v1791_v22 = vpop.eup %1790 }
 0x223   :  { %v1793_v23 = vpop.eup %1792  ;;  %v329_v29 = vmul.f32 %v1791_v22, %v2138_v16  ;;  %v357_v9 = vadd.f32 %v1559_v28, %v342_v26 }
 0x224   :  { %v328_v27 = vmul.f32 %v1793_v23, %v2135_v15 }
 0x225   :  { %v344_v37 = vmul.f32 %v1558_v21, %v329_v29 }
 0x226   :  { %v1795_v30 = vpop.eup %1794  ;;  %v343_v31 = vmul.f32 %v1558_v21, %v328_v27 }
 0x227   :  { %v1797_v32 = vpop.eup %1796  ;;  %v331_v38 = vmul.f32 %v1795_v30, %v2146_v24  ;;  %v359_v45 = vadd.f32 %v1559_v28, %v344_v37 }
 0x228   :  { %v358_v33 = vadd.f32 %v1559_v28, %v343_v31  ;;  %v330_v36 = vmul.f32 %v1797_v32, %v2149_v25 }
 0x229   :  { %v346_v48 = vmul.f32 %v1558_v21, %v331_v38 }
 0x22a   :  { %v1799_v39 = vpop.eup %1798  ;;  %v365_v40 = vpack.c.bf16 %v358_v33, %v357_v9  ;;  %v345_v41 = vmul.f32 %v1558_v21, %v330_v36 }
 0x22b   :  { %v1801_v15 = vpop.eup %1800  ;;  %v333_v43 = vmul.f32 %v1799_v39, %v2158_v34  ;;  %v361_v24 = vadd.f32 %v1559_v28, %v346_v48 }
 0x22c   :  { %1689 = vmatprep.mubr.msk.bf16.mxu1 %vm229_vm0, %v365_v40  ;;  %v360_v16 = vadd.f32 %v1559_v28, %v345_v41  ;;  %v332_v46 = vmul.f32 %v1801_v15, %v2161_v35  ;;  %v1777_v35 = vld [vmem:[%s2668_s7] sm:$0xff]  }
 0x22d   :  { %v348_v54 = vmul.f32 %v1558_v21, %v333_v43  ;;  %1697 = vmatprep.subr.bf16.mxu1 %v1777_v35 }
 0x22e   :  { %v1803_v49 = vpop.eup %1802  ;;  %v366_v50 = vpack.c.bf16 %v360_v16, %v359_v45  ;;  %v347_v52 = vmul.f32 %v1558_v21, %v332_v46 }
 0x22f   :  { %v334_v25 = vmul.f32 %v1803_v49, %v2170_v42  ;;  %v363_v34 = vadd.f32 %v1559_v28, %v348_v54  ;;  %v1560_v42 = vld [vmem:[%s2667_s6] ss:$0 sm:$0xff] }
 0x230   :  { %1690 = vmatmul.mubr.msk.bf16.vlgmr.msra.gmra.mxu1 %vm229_vm0, %v366_v50  ;;  %v362_v55 = vadd.f32 %v1559_v28, %v347_v52 }
 0x231   :  { %v349_v56 = vmul.f32 %v1558_v21, %v334_v25  ;;  %1698 = vmatpush3.bf16.msra.mxu1 %v1777_v35 }
 0x232   :  { %v367_v57 = vpack.c.bf16 %v362_v55, %v361_v24 }
 0x233   :  { %v364_v59 = vadd.f32 %v1559_v28, %v349_v56 }
 0x234   :  { %1693 = vmatprep.mubr.msk.bf16.mxu1 %vm229_vm0, %v367_v57 }
 0x235   :  { %v368_v60 = vpack.c.bf16 %v364_v59, %v363_v34 }
 0x238   :  { %1694 = vmatmul.mubr.msk.bf16.gmra.mxu1 %vm229_vm0, %v368_v60 }
 0x2f0   :  { %v1691_v62 = vpop.f32.mrf.mxu1 }
 0x2f1   :  { %v2204_v63 = vadd.f32 %v1691_v62, %v1560_v42 }
 0x2f2   :  { %v430_v0 = vpop.f32.mrf.mxu1 }
 0x2f3   :  { %v463_v2 = vmul.f32 %v2204_v63, %v2204_v63  ;;  %v2208_v4 = vadd.f32 %v1560_v42, %v430_v0 }
 0x2f4   :  { %v1692_v5 = vpop.f32.mrf.mxu1 }
 0x2f5   :  { %v471_v6 = vmul.f32 %v463_v2, %v2204_v63  ;;  %v461_v7 = vmul.f32 %v2208_v4, %v2208_v4  ;;  %v2213_v8 = vadd.f32 %v1692_v5, %v1560_v42 }
 0x2f6   :  { %v433_v10 = vpop.f32.mrf.mxu1 }
 0x2f7   :  { %v479_v11 = vmul.f32 0.044715, %v471_v6  ;;  %v469_v12 = vmul.f32 %v461_v7, %v2208_v4  ;;  %v464_v13 = vmul.f32 %v2213_v8, %v2213_v8  ;;  %v2218_v14 = vadd.f32 %v1560_v42, %v433_v10 }
 0x2f8   :  { %v1695_v17 = vpop.f32.mrf.mxu1 }
 0x2f9   :  { %v487_v18 = vadd.f32 %v479_v11, %v2204_v63  ;;  %v477_v19 = vmul.f32 0.044715, %v469_v12  ;;  %v472_v20 = vmul.f32 %v464_v13, %v2213_v8  ;;  %v462_v21 = vmul.f32 %v2218_v14, %v2218_v14 }
 0x2fa   :  { %v2224_v22 = vadd.f32 %v1695_v17, %v1560_v42  ;;  %v446_v23 = vpop.f32.mrf.mxu1 }
 0x2fb   :  { %v495_v26 = vmul.f32 0.7978846, %v487_v18  ;;  %v485_v27 = vadd.f32 %v477_v19, %v2208_v4  ;;  %v480_v28 = vmul.f32 0.044715, %v472_v20  ;;  %v470_v29 = vmul.f32 %v462_v21, %v2218_v14 }
 0x2fc   :  { %v467_v30 = vmul.f32 %v2224_v22, %v2224_v22  ;;  %v2230_v31 = vadd.f32 %v1560_v42, %v446_v23  ;;  %v1696_v32 = vpop.f32.mrf.mxu1 }
 0x2fd   :  { %v493_v9 = vmul.f32 0.7978846, %v485_v27  ;;  %v488_v33 = vadd.f32 %v480_v28, %v2213_v8  ;;  %v478_v36 = vmul.f32 0.044715, %v470_v29  ;;  %1804 = vtanh.f32 %v495_v26 }
 0x2fe   :  { %v475_v37 = vmul.f32 %v467_v30, %v2224_v22  ;;  %v465_v38 = vmul.f32 %v2230_v31, %v2230_v31  ;;  %v458_v39 = vadd.f32 %v1696_v32, %v1560_v42  ;;  %v449_v40 = vpop.f32.mrf.mxu1 }
 0x2ff   :  { %1806 = vtanh.f32 %v493_v9  ;;  %v496_v41 = vmul.f32 0.7978846, %v488_v33  ;;  %v486_v15 = vadd.f32 %v478_v36, %v2218_v14  ;;  %v450_v43 = vadd.f32 %v1560_v42, %v449_v40 }
 0x300   :  { %v483_v45 = vmul.f32 0.044715, %v475_v37  ;;  %v473_v16 = vmul.f32 %v465_v38, %v2230_v31  ;;  %v468_v46 = vmul.f32 %v458_v39, %v458_v39 }
 0x301   :  { %1808 = vtanh.f32 %v496_v41  ;;  %v494_v48 = vmul.f32 0.7978846, %v486_v15  ;;  %v466_v49 = vmul.f32 %v450_v43, %v450_v43 }
 0x302   :  { %v491_v50 = vadd.f32 %v483_v45, %v2224_v22  ;;  %v481_v52 = vmul.f32 0.044715, %v473_v16  ;;  %v476_v25 = vmul.f32 %v468_v46, %v458_v39 }
 0x303   :  { %1810 = vtanh.f32 %v494_v48  ;;  %v474_v54 = vmul.f32 %v466_v49, %v450_v43  ;;  %v1566_v48 = vld [vmem:[%s2669_s8] ss:$0 sm:$0xff] }
 0x304   :  { %v499_v24 = vmul.f32 0.7978846, %v491_v50  ;;  %v489_v55 = vadd.f32 %v481_v52, %v2230_v31  ;;  %v484_v56 = vmul.f32 0.044715, %v476_v25 }
 0x305   :  { %v482_v57 = vmul.f32 0.044715, %v474_v54 }
 0x306   :  { %1812 = vtanh.f32 %v499_v24  ;;  %v497_v34 = vmul.f32 0.7978846, %v489_v55  ;;  %v492_v59 = vadd.f32 %v484_v56, %v458_v39 }
 0x307   :  { %v490_v60 = vadd.f32 %v482_v57, %v450_v43 }
 0x308   :  { %1814 = vtanh.f32 %v497_v34  ;;  %v500_v35 = vmul.f32 0.7978846, %v492_v59 }
 0x309   :  { %v498_v42 = vmul.f32 0.7978846, %v490_v60 }
 0x30a   :  { %1816 = vtanh.f32 %v500_v35  ;;  %v1805_v62 = vpop.eup %1804 }
 0x30b   :  { %1818 = vtanh.f32 %v498_v42  ;;  %v511_v6 = vadd.f32 1.0, %v1805_v62 }
 0x30c   :  { %v1807_v0 = vpop.eup %1806 }
 0x30d   :  { %v509_v2 = vadd.f32 1.0, %v1807_v0  ;;  %v519_v17 = vmul.f32 0.5, %v511_v6 }
 0x30e   :  { %v1809_v5 = vpop.eup %1808 }
 0x30f   :  { %v512_v7 = vadd.f32 1.0, %v1809_v5  ;;  %v517_v11 = vmul.f32 0.5, %v509_v2  ;;  %v527_v27 = vmul.f32 %v519_v17, %v2204_v63 }
 0x310   :  { %v1811_v10 = vpop.eup %1810 }
 0x311   :  { %v520_v12 = vmul.f32 0.5, %v512_v7  ;;  %v510_v13 = vadd.f32 1.0, %v1811_v10  ;;  %v525_v23 = vmul.f32 %v517_v11, %v2208_v4 }
 0x313   :  { %v1813_v18 = vpop.eup %1812  ;;  %v518_v19 = vmul.f32 0.5, %v510_v13  ;;  %v528_v20 = vmul.f32 %v520_v12, %v2213_v8 }
 0x314   :  { %v515_v28 = vadd.f32 1.0, %v1813_v18 }
 0x315   :  { %v1815_v21 = vpop.eup %1814  ;;  %v526_v26 = vmul.f32 %v518_v19, %v2218_v14  ;;  %v534_v33 = vpack.c.bf16 %v528_v20, %v527_v27 }
 0x316   :  { %v513_v29 = vadd.f32 1.0, %v1815_v21  ;;  %v523_v40 = vmul.f32 0.5, %v515_v28 }
 0x317   :  { %v1817_v30 = vpop.eup %1816  ;;  %v533_v32 = vpack.c.bf16 %v526_v26, %v525_v23 }
 0x318   :  { %v1819_v9 = vpop.eup %1818  ;;  %v516_v36 = vadd.f32 1.0, %v1817_v30  ;;  %v521_v37 = vmul.f32 0.5, %v513_v29  ;;  %v531_v15 = vmul.f32 %v523_v40, %v2224_v22 }
 0x319   :  { %v514_v38 = vadd.f32 1.0, %v1819_v9  ;;  %1699 = vmatprep.mubr.msk.bf16.mxu1 %vm229_vm0, %v533_v32 }
 0x31a   :  { %v524_v8 = vmul.f32 0.5, %v516_v36  ;;  %1700 = vmatmul.mubr.msk.bf16.vlgmr.msra.gmra.mxu1 %vm229_vm0, %v534_v33  ;;  %v529_v14 = vmul.f32 %v521_v37, %v2230_v31 }
 0x31b   :  { %v522_v4 = vmul.f32 0.5, %v514_v38 }
 0x31c   :  { %v532_v41 = vmul.f32 %v524_v8, %v458_v39 }
 0x31d   :  { %v530_v63 = vmul.f32 %v522_v4, %v450_v43 }
 0x31e   :  { %v536_v16 = vpack.c.bf16 %v532_v41, %v531_v15 }
 0x31f   :  { %v535_v45 = vpack.c.bf16 %v530_v63, %v529_v14 }
 0x321   :  { %1703 = vmatprep.mubr.msk.bf16.mxu1 %vm229_vm0, %v535_v45 }
 0x322   :  { %1704 = vmatmul.mubr.msk.bf16.gmra.mxu1 %vm229_vm0, %v536_v16 }
 0x3da   :  { %v1701_v46 = vpop.f32.mrf.mxu1 }
 0x3db   :  { %v607_v50 = vadd.f32 %v1701_v46, %v1566_v48 }
 0x3dc   :  { %v598_v49 = vpop.f32.mrf.mxu1 }
 0x3dd   :  { %v599_v52 = vadd.f32 %v1566_v48, %v598_v49  ;;  %v2257_v25 = vadd.f32 %v607_v50, %v2099_v47 }
 0x3de   :  { %v1702_v39 = vpop.f32.mrf.mxu1 }
 0x3df   :  { %v2254_v31 = vadd.f32 %v599_v52, %v2097_v44  ;;  %v610_v43 = vadd.f32 %v1702_v39, %v1566_v48  ;;  %v643_v47 = vsel %vm229_vm0, %v2257_v25, 0.0 }
 0x3e0   :  { %v601_v22 = vpop.f32.mrf.mxu1 }
 0x3e1   :  { %v602_v54 = vadd.f32 %v1566_v48, %v601_v22  ;;  %v637_v24 = vsel %vm229_vm0, %v2254_v31, 0.0  ;;  %v2265_v57 = vadd.f32 %v610_v43, %v2105_v53 }
 0x3e2   :  { %638 = vadd.xlane.f32.xlu1 %v637_v24  ;;  %v1705_v55 = vpop.f32.mrf.mxu1  ;;  %v1189_v24 = vld [vmem:[%s2674_s14] sm:$0xff] }
 0x3e3   :  { %v2262_v56 = vadd.f32 %v602_v54, %v2103_v51  ;;  %v623_v44 = vadd.f32 %v1705_v55, %v1566_v48  ;;  %v646_v53 = vsel %vm229_vm0, %v2265_v57, 0.0  ;;  %v1191_v55 = vld [vmem:[%s2674_s14 + $0x10] sm:$0xff] }
 0x3e4   :  { %v614_v34 = vpop.f32.mrf.mxu1 }
 0x3e5   :  { %v615_v59 = vadd.f32 %v1566_v48, %v614_v34  ;;  %v640_v60 = vsel %vm229_vm0, %v2262_v56, 0.0  ;;  %v2277_v62 = vadd.f32 %v623_v44, %v2113_v61  ;;  %v1192_v34 = vld [vmem:[%s2674_s14 + $0x18] sm:$0xff]  ;;  %v1190_v44 = vld [vmem:[%s2674_s14 + $0x8] sm:$0xff] }
 0x3e6   :  { %641 = vadd.xlane.f32.xlu0 %v640_v60  ;;  %644 = vadd.xlane.f32.xlu1 %v643_v47  ;;  %v1706_v35 = vpop.f32.mrf.mxu1  ;;  %v1778_v60 = vld [vmem:[%s2666_s5 + $0x8] sm:$0xff]   ;;  %v1193_v47 = vld [vmem:[%s2674_s14 + $0x20] sm:$0xff] }
 0x3e7   :  { %v2272_v42 = vadd.f32 %v615_v59, %v2111_v58  ;;  %v626_v0 = vadd.f32 %v1706_v35, %v1566_v48  ;;  %v655_v61 = vsel %vm229_vm0, %v2277_v62, 0.0  ;;  %v1194_v59 = vld [vmem:[%s2674_s14 + $0x28] sm:$0xff]  ;;  %1707 = vmatprep.subr.bf16.mxu1 %v1778_v60  ;;  %v1196_v35 = vld [vmem:[%s2674_s14 + $0x38] sm:$0xff] }
 0x3e8   :  { %v617_v51 = vpop.f32.mrf.mxu1  ;;  %1708 = vmatpush3.bf16.msra.mxu1 %v1778_v60 }
 0x3e9   :  { %v618_v2 = vadd.f32 %v1566_v48, %v617_v51  ;;  %v649_v5 = vsel %vm229_vm0, %v2272_v42, 0.0  ;;  %v2285_v58 = vadd.f32 %v626_v0, %v2121_v3  ;;  %v1195_v51 = vld [vmem:[%s2674_s14 + $0x30] sm:$0xff]  ;;  %v1197_v0 = vld [vmem:[%s2674_s14 + $0x40] sm:$0xff] }
 0x3ea   :  { %647 = vadd.xlane.f32.xlu0 %v646_v53  ;;  %650 = vadd.xlane.f32.xlu1 %v649_v5  ;;  %v1198_v53 = vld [vmem:[%s2674_s14 + $0x48] sm:$0xff]  ;;  %v1199_v5 = vld [vmem:[%s2674_s14 + $0x50] sm:$0xff] }
 0x3eb   :  { %v2282_v6 = vadd.f32 %v618_v2, %v2119_v1  ;;  %v658_v10 = vsel %vm229_vm0, %v2285_v58, 0.0  ;;  %v1200_v2 = vld [vmem:[%s2674_s14 + $0x58] sm:$0xff] }
 0x3ed   :  { %v652_v7 = vsel %vm229_vm0, %v2282_v6, 0.0 }
 0x3ee   :  { %653 = vadd.xlane.f32.xlu0 %v652_v7  ;;  %656 = vadd.xlane.f32.xlu1 %v655_v61  ;;  %v1202_v7 = vld [vmem:[%s2674_s14 + $0x68] sm:$0xff]  ;;  %v1201_v61 = vld [vmem:[%s2674_s14 + $0x60] sm:$0xff] }
 0x3f2   :  { %659 = vadd.xlane.f32.xlu0 %v658_v10  ;;  %v1204_v10 = vld [vmem:[%s2674_s14 + $0x78] sm:$0xff] }
 0x46b   :  { %v639_v11 = vpop.xlane.xlu1 %638 }
 0x46c   :  { %v661_v12 = vmul.f32 0.0625, %v639_v11  ;;  %v1203_v11 = vld [vmem:[%s2674_s14 + $0x70] sm:$0xff]  ;;  %s1868_s14 = scalar_lea.vmem %s1529_s19, 32 }
 0x46d   :  { %p1869_p0 = scmp.ne.s32.totalorder %s1529_s19, %s1868_s14  ;;  %p1874_p2 = scmp.lt.s32.totalorder %s1868_s14, %s1868_s14 }
 0x46e   :  { %v2294_v1 = vsub.f32 %v2254_v31, %v661_v12 }
 0x46f   :  { %v642_v13 = vpop.xlane.xlu0 %641  ;;  %v645_v3 = vpop.xlane.xlu1 %644  ;;  %p1875_p3 = por %p1874_p2, %p1873_p1 }
 0x470   :  { %v662_v17 = vmul.f32 0.0625, %v642_v13  ;;  %v663_v18 = vmul.f32 0.0625, %v645_v3  ;;  %v677_v19 = vmul.f32 %v2294_v1, %v2294_v1 }
 0x471   :  { %p1876_p4 = pnand %p1875_p3, %p1869_p0 }
 0x472   :  { %v2299_v20 = vsub.f32 %v2262_v56, %v662_v17  ;;  %v2302_v21 = vsub.f32 %v2257_v25, %v663_v18  ;;  %v685_v23 = vsel %vm229_vm0, %v677_v19, 0.0 }
 0x473   :  { %v648_v26 = vpop.xlane.xlu0 %647  ;;  %686 = vadd.xlane.f32.xlu1 %v685_v23  ;;  %v651_v27 = vpop.xlane.xlu1 %650 }
 0x474   :  { %v664_v28 = vmul.f32 0.0625, %v648_v26  ;;  %v665_v29 = vmul.f32 0.0625, %v651_v27  ;;  %v678_v30 = vmul.f32 %v2299_v20, %v2299_v20  ;;  %v679_v32 = vmul.f32 %v2302_v21, %v2302_v21 }
 0x476   :  { %v2310_v9 = vsub.f32 %v2265_v57, %v664_v28  ;;  %v2313_v33 = vsub.f32 %v2272_v42, %v665_v29  ;;  %v688_v36 = vsel %vm229_vm0, %v678_v30, 0.0  ;;  %v691_v37 = vsel %vm229_vm0, %v679_v32, 0.0 }
 0x477   :  { %689 = vadd.xlane.f32.xlu0 %v688_v36  ;;  %v654_v38 = vpop.xlane.xlu0 %653  ;;  %692 = vadd.xlane.f32.xlu1 %v691_v37  ;;  %v657_v40 = vpop.xlane.xlu1 %656 }
 0x478   :  { %v666_v8 = vmul.f32 0.0625, %v654_v38  ;;  %v667_v4 = vmul.f32 0.0625, %v657_v40  ;;  %v680_v41 = vmul.f32 %v2310_v9, %v2310_v9  ;;  %v681_v14 = vmul.f32 %v2313_v33, %v2313_v33 }
 0x47a   :  { %v2322_v63 = vsub.f32 %v2282_v6, %v666_v8  ;;  %v2325_v15 = vsub.f32 %v2277_v62, %v667_v4  ;;  %v694_v45 = vsel %vm229_vm0, %v680_v41, 0.0  ;;  %v697_v16 = vsel %vm229_vm0, %v681_v14, 0.0 }
 0x47b   :  { %695 = vadd.xlane.f32.xlu0 %v694_v45  ;;  %v660_v46 = vpop.xlane.xlu0 %659  ;;  %698 = vadd.xlane.f32.xlu1 %v697_v16 }
 0x47c   :  { %v668_v48 = vmul.f32 0.0625, %v660_v46  ;;  %v682_v49 = vmul.f32 %v2322_v63, %v2322_v63  ;;  %v683_v50 = vmul.f32 %v2325_v15, %v2325_v15 }
 0x47e   :  { %v2334_v52 = vsub.f32 %v2285_v58, %v668_v48  ;;  %v700_v39 = vsel %vm229_vm0, %v682_v49, 0.0  ;;  %v703_v43 = vsel %vm229_vm0, %v683_v50, 0.0  ;;  %v1573_v50 = vld [vmem:[%s2664_s3 + $0x1] ss:$0 sm:$0xff] }
 0x47f   :  { %701 = vadd.xlane.f32.xlu0 %v700_v39  ;;  %704 = vadd.xlane.f32.xlu1 %v703_v43 }
 0x480   :  { %v684_v22 = vmul.f32 %v2334_v52, %v2334_v52 }
 0x482   :  { %v706_v54 = vsel %vm229_vm0, %v684_v22, 0.0 }
 0x483   :  { %707 = vadd.xlane.f32.xlu0 %v706_v54 }
 0x490   :  { %1207 = vperm.xlu1 %1771, %v1189_v24  }
 0x494   :  { %1217 = vperm.xlu1 %1771, %v1191_v55   ;;  %v1575_v55 = vld [vmem:[%s2665_s4 + $0x1] ss:$0 sm:$0xff] }
 0x498   :  { %1222 = vperm.xlu1 %1771, %v1192_v34  }
 0x499   :  { %1212 = vperm.xlu0 %1770, %v1190_v44  }
 0x49c   :  { %1232 = vperm.xlu1 %1771, %v1194_v59  }
 0x49d   :  { %1227 = vperm.xlu0 %1770, %v1193_v47  }
 0x4a0   :  { %1242 = vperm.xlu1 %1771, %v1196_v35  }
 0x4a1   :  { %1237 = vperm.xlu0 %1770, %v1195_v51  }
 0x4a4   :  { %1252 = vperm.xlu1 %1771, %v1198_v53  }
 0x4a5   :  { %1247 = vperm.xlu0 %1770, %v1197_v0  }
 0x4a8   :  { %1262 = vperm.xlu1 %1771, %v1200_v2  }
 0x4a9   :  { %1257 = vperm.xlu0 %1770, %v1199_v5  }
 0x4ac   :  { %1272 = vperm.xlu1 %1771, %v1202_v7  }
 0x4ad   :  { %1267 = vperm.xlu0 %1770, %v1201_v61  }
 0x4b0   :  { %1282 = vperm.xlu1 %1771, %v1204_v10  }
 0x4b1   :  { %1277 = vperm.xlu0 %1770, %v1203_v11  }
 0x4fc   :  { %v687_v12 = vpop.xlane.xlu1 %686 }
 0x4fd   :  { %v709_v13 = vmul.f32 0.0625, %v687_v12 }
 0x4ff   :  { %v717_v3 = vadd.f32 1e-05, %v709_v13 }
 0x500   :  { %v690_v17 = vpop.xlane.xlu0 %689  ;;  %v693_v18 = vpop.xlane.xlu1 %692 }
 0x501   :  { %1820 = vrsqrt.f32 %v717_v3  ;;  %v710_v19 = vmul.f32 0.0625, %v690_v17  ;;  %v711_v23 = vmul.f32 0.0625, %v693_v18 }
 0x503   :  { %v718_v26 = vadd.f32 1e-05, %v710_v19  ;;  %v719_v27 = vadd.f32 1e-05, %v711_v23 }
 0x504   :  { %v696_v28 = vpop.xlane.xlu0 %695  ;;  %v699_v29 = vpop.xlane.xlu1 %698 }
 0x505   :  { %1822 = vrsqrt.f32 %v718_v26  ;;  %v712_v30 = vmul.f32 0.0625, %v696_v28  ;;  %v713_v32 = vmul.f32 0.0625, %v699_v29 }
 0x506   :  { %1824 = vrsqrt.f32 %v719_v27 }
 0x507   :  { %v720_v36 = vadd.f32 1e-05, %v712_v30  ;;  %v721_v37 = vadd.f32 1e-05, %v713_v32 }
 0x508   :  { %v702_v38 = vpop.xlane.xlu0 %701  ;;  %v705_v40 = vpop.xlane.xlu1 %704 }
 0x509   :  { %1826 = vrsqrt.f32 %v720_v36  ;;  %v714_v8 = vmul.f32 0.0625, %v702_v38  ;;  %v715_v4 = vmul.f32 0.0625, %v705_v40 }
 0x50a   :  { %1828 = vrsqrt.f32 %v721_v37 }
 0x50b   :  { %v722_v41 = vadd.f32 1e-05, %v714_v8  ;;  %v723_v14 = vadd.f32 1e-05, %v715_v4 }
 0x50c   :  { %v708_v45 = vpop.xlane.xlu0 %707 }
 0x50d   :  { %1830 = vrsqrt.f32 %v722_v41  ;;  %v716_v16 = vmul.f32 0.0625, %v708_v45 }
 0x50e   :  { %v1821_v46 = vpop.eup %1820  ;;  %1832 = vrsqrt.f32 %v723_v14 }
 0x50f   :  { %v724_v48 = vadd.f32 1e-05, %v716_v16  ;;  %v733_v49 = vmul.f32 %v1821_v46, %v2294_v1 }
 0x511   :  { %1834 = vrsqrt.f32 %v724_v48  ;;  %v749_v54 = vmul.f32 %v1573_v50, %v733_v49 }
 0x512   :  { %v1823_v39 = vpop.eup %1822 }
 0x513   :  { %v1825_v43 = vpop.eup %1824  ;;  %v734_v22 = vmul.f32 %v1823_v39, %v2299_v20  ;;  %v765_v47 = vadd.f32 %v1575_v55, %v749_v54 }
 0x514   :  { %v735_v24 = vmul.f32 %v1825_v43, %v2302_v21 }
 0x515   :  { %v750_v34 = vmul.f32 %v1573_v50, %v734_v22 }
 0x516   :  { %v1827_v44 = vpop.eup %1826  ;;  %v751_v1 = vmul.f32 %v1573_v50, %v735_v24 }
 0x517   :  { %v1829_v59 = vpop.eup %1828  ;;  %v736_v60 = vmul.f32 %v1827_v44, %v2310_v9  ;;  %v766_v35 = vadd.f32 %v1575_v55, %v750_v34 }
 0x518   :  { %v737_v51 = vmul.f32 %v1829_v59, %v2313_v33  ;;  %v767_v21 = vadd.f32 %v1575_v55, %v751_v1 }
 0x519   :  { %v752_v53 = vmul.f32 %v1573_v50, %v736_v60  ;;  %v773_v0 = vpack.c.bf16 %v766_v35, %v765_v47 }
 0x51a   :  { %v1831_v20 = vpop.eup %1830  ;;  %v753_v61 = vmul.f32 %v1573_v50, %v737_v51 }
 0x51b   :  { %v1833_v2 = vpop.eup %1832  ;;  %1709 = vmatprep.mubr.msk.bf16.mxu1 %vm229_vm0, %v773_v0  ;;  %v768_v5 = vadd.f32 %v1575_v55, %v752_v53  ;;  %v738_v7 = vmul.f32 %v1831_v20, %v2322_v63 }
 0x51c   :  { %v739_v10 = vmul.f32 %v1833_v2, %v2325_v15  ;;  %v769_v13 = vadd.f32 %v1575_v55, %v753_v61  ;;  %v1779_v15 = vld [vmem:[%s2668_s7 + $0x8] sm:$0xff]  }
 0x51d   :  { %v774_v11 = vpack.c.bf16 %v768_v5, %v767_v21  ;;  %v754_v12 = vmul.f32 %v1573_v50, %v738_v7  ;;  %1717 = vmatprep.subr.bf16.mxu1 %v1779_v15 }
 0x51e   :  { %v1835_v9 = vpop.eup %1834  ;;  %v755_v17 = vmul.f32 %v1573_v50, %v739_v10 }
 0x51f   :  { %1710 = vmatmul.mubr.msk.bf16.vlgmr.msra.gmra.mxu1 %vm229_vm0, %v774_v11  ;;  %v770_v33 = vadd.f32 %v1575_v55, %v754_v12  ;;  %v740_v3 = vmul.f32 %v1835_v9, %v2334_v52  ;;  %v1579_v52 = vld [vmem:[%s2667_s6 + $0x1] ss:$0 sm:$0xff] }
 0x520   :  { %v771_v23 = vadd.f32 %v1575_v55, %v755_v17  ;;  %1718 = vmatpush3.bf16.msra.mxu1 %v1779_v15 }
 0x521   :  { %v775_v18 = vpack.c.bf16 %v770_v33, %v769_v13  ;;  %v756_v19 = vmul.f32 %v1573_v50, %v740_v3 }
 0x523   :  { %1713 = vmatprep.mubr.msk.bf16.mxu1 %vm229_vm0, %v775_v18  ;;  %v772_v26 = vadd.f32 %v1575_v55, %v756_v19 }
 0x525   :  { %v776_v63 = vpack.c.bf16 %v772_v26, %v771_v23 }
 0x527   :  { %1714 = vmatmul.mubr.msk.bf16.gmra.mxu1 %vm229_vm0, %v776_v63 }
 0x5df   :  { %v1711_v27 = vpop.f32.mrf.mxu1 }
 0x5e0   :  { %v2416_v28 = vadd.f32 %v1711_v27, %v1579_v52 }
 0x5e1   :  { %v840_v29 = vpop.f32.mrf.mxu1 }
 0x5e2   :  { %v873_v30 = vmul.f32 %v2416_v28, %v2416_v28  ;;  %v2420_v32 = vadd.f32 %v1579_v52, %v840_v29 }
 0x5e3   :  { %v1712_v36 = vpop.f32.mrf.mxu1 }
 0x5e4   :  { %v881_v37 = vmul.f32 %v873_v30, %v2416_v28  ;;  %v871_v38 = vmul.f32 %v2420_v32, %v2420_v32  ;;  %v2425_v40 = vadd.f32 %v1712_v36, %v1579_v52 }
 0x5e5   :  { %v843_v8 = vpop.f32.mrf.mxu1 }
 0x5e6   :  { %v889_v4 = vmul.f32 0.044715, %v881_v37  ;;  %v879_v41 = vmul.f32 %v871_v38, %v2420_v32  ;;  %v874_v14 = vmul.f32 %v2425_v40, %v2425_v40  ;;  %v2430_v45 = vadd.f32 %v1579_v52, %v843_v8 }
 0x5e7   :  { %v1715_v16 = vpop.f32.mrf.mxu1 }
 0x5e8   :  { %v897_v46 = vadd.f32 %v889_v4, %v2416_v28  ;;  %v887_v48 = vmul.f32 0.044715, %v879_v41  ;;  %v882_v49 = vmul.f32 %v874_v14, %v2425_v40  ;;  %v872_v50 = vmul.f32 %v2430_v45, %v2430_v45 }
 0x5e9   :  { %v2436_v39 = vadd.f32 %v1715_v16, %v1579_v52  ;;  %v856_v43 = vpop.f32.mrf.mxu1 }
 0x5ea   :  { %v905_v22 = vmul.f32 0.7978846, %v897_v46  ;;  %v895_v54 = vadd.f32 %v887_v48, %v2420_v32  ;;  %v890_v24 = vmul.f32 0.044715, %v882_v49  ;;  %v880_v55 = vmul.f32 %v872_v50, %v2430_v45 }
 0x5eb   :  { %v877_v34 = vmul.f32 %v2436_v39, %v2436_v39  ;;  %v2442_v44 = vadd.f32 %v1579_v52, %v856_v43  ;;  %v1716_v59 = vpop.f32.mrf.mxu1 }
 0x5ec   :  { %v903_v1 = vmul.f32 0.7978846, %v895_v54  ;;  %v898_v60 = vadd.f32 %v890_v24, %v2425_v40  ;;  %v888_v47 = vmul.f32 0.044715, %v880_v55  ;;  %1836 = vtanh.f32 %v905_v22 }
 0x5ed   :  { %v885_v35 = vmul.f32 %v877_v34, %v2436_v39  ;;  %v875_v51 = vmul.f32 %v2442_v44, %v2442_v44  ;;  %v868_v53 = vadd.f32 %v1716_v59, %v1579_v52  ;;  %v859_v0 = vpop.f32.mrf.mxu1 }
 0x5ee   :  { %1838 = vtanh.f32 %v903_v1  ;;  %v906_v20 = vmul.f32 0.7978846, %v898_v60  ;;  %v896_v2 = vadd.f32 %v888_v47, %v2430_v45  ;;  %v860_v21 = vadd.f32 %v1579_v52, %v859_v0 }
 0x5ef   :  { %v893_v5 = vmul.f32 0.044715, %v885_v35  ;;  %v883_v7 = vmul.f32 %v875_v51, %v2442_v44  ;;  %v878_v61 = vmul.f32 %v868_v53, %v868_v53 }
 0x5f0   :  { %1840 = vtanh.f32 %v906_v20  ;;  %v904_v10 = vmul.f32 0.7978846, %v896_v2  ;;  %v876_v11 = vmul.f32 %v860_v21, %v860_v21 }
 0x5f1   :  { %v901_v12 = vadd.f32 %v893_v5, %v2436_v39  ;;  %v891_v9 = vmul.f32 0.044715, %v883_v7  ;;  %v886_v13 = vmul.f32 %v878_v61, %v868_v53  ;;  %v1913_v61 = vmov 0.0  }
 0x5f2   :  { %1842 = vtanh.f32 %v904_v10  ;;  %v884_v33 = vmul.f32 %v876_v11, %v860_v21  ;;  %1727 = vmatprep.subr.bf16.mxu1 %v1913_v61  ;;  %v1780_v10 = vld [vmem:[%s2673_s13] sm:$0xff]  }
 0x5f3   :  { %v909_v3 = vmul.f32 0.7978846, %v901_v12  ;;  %v899_v17 = vadd.f32 %v891_v9, %v2442_v44  ;;  %v894_v18 = vmul.f32 0.044715, %v886_v13  ;;  %1747 = vmatprep.mubr.msk.bf16.mxu0 %vm1127_vm1, %v1780_v10  ;;  %v1594_v11 = vld [vmem:[%s2670_s9] ss:$0 sm:$0xff] }
 0x5f4   :  { %v892_v19 = vmul.f32 0.044715, %v884_v33 }
 0x5f5   :  { %1844 = vtanh.f32 %v909_v3  ;;  %v907_v23 = vmul.f32 0.7978846, %v899_v17  ;;  %v902_v26 = vadd.f32 %v894_v18, %v868_v53 }
 0x5f6   :  { %v900_v63 = vadd.f32 %v892_v19, %v860_v21 }
 0x5f7   :  { %1846 = vtanh.f32 %v907_v23  ;;  %v910_v15 = vmul.f32 0.7978846, %v902_v26 }
 0x5f8   :  { %v908_v52 = vmul.f32 0.7978846, %v900_v63 }
 0x5f9   :  { %1848 = vtanh.f32 %v910_v15  ;;  %v1837_v27 = vpop.eup %1836 }
 0x5fa   :  { %1850 = vtanh.f32 %v908_v52  ;;  %v921_v37 = vadd.f32 1.0, %v1837_v27 }
 0x5fb   :  { %v1839_v29 = vpop.eup %1838 }
 0x5fc   :  { %v919_v30 = vadd.f32 1.0, %v1839_v29  ;;  %v929_v16 = vmul.f32 0.5, %v921_v37 }
 0x5fd   :  { %v1841_v36 = vpop.eup %1840 }
 0x5fe   :  { %v922_v38 = vadd.f32 1.0, %v1841_v36  ;;  %v927_v4 = vmul.f32 0.5, %v919_v30  ;;  %v937_v54 = vmul.f32 %v929_v16, %v2416_v28 }
 0x5ff   :  { %v1843_v8 = vpop.eup %1842 }
 0x600   :  { %v930_v41 = vmul.f32 0.5, %v922_v38  ;;  %v920_v14 = vadd.f32 1.0, %v1843_v8  ;;  %v935_v43 = vmul.f32 %v927_v4, %v2420_v32 }
 0x602   :  { %v1845_v46 = vpop.eup %1844  ;;  %v928_v48 = vmul.f32 0.5, %v920_v14  ;;  %v938_v49 = vmul.f32 %v930_v41, %v2425_v40 }
 0x603   :  { %v925_v24 = vadd.f32 1.0, %v1845_v46 }
 0x604   :  { %v1847_v50 = vpop.eup %1846  ;;  %v936_v22 = vmul.f32 %v928_v48, %v2430_v45  ;;  %v944_v60 = vpack.c.bf16 %v938_v49, %v937_v54  ;;  %v1782_v54 = vld [vmem:[%s2673_s13 + $0x10] sm:$0xff]  }
 0x605   :  { %v923_v55 = vadd.f32 1.0, %v1847_v50  ;;  %v933_v0 = vmul.f32 0.5, %v925_v24  ;;  %v1783_v24 = vld [vmem:[%s2673_s13 + $0x18] sm:$0xff]  }
 0x606   :  { %v1849_v34 = vpop.eup %1848  ;;  %v943_v59 = vpack.c.bf16 %v936_v22, %v935_v43  ;;  %v1781_v22 = vld [vmem:[%s2673_s13 + $0x8] sm:$0xff]  }
 0x607   :  { %v1851_v1 = vpop.eup %1850  ;;  %v926_v47 = vadd.f32 1.0, %v1849_v34  ;;  %v931_v35 = vmul.f32 0.5, %v923_v55  ;;  %v941_v2 = vmul.f32 %v933_v0, %v2436_v39  ;;  %v1588_v39 = vld [vmem:[%s2669_s8 + $0x1] ss:$0 sm:$0xff]  ;;  %v1785_v34 = vld [vmem:[%s2673_s13 + $0x28] sm:$0xff]  }
 0x608   :  { %v924_v51 = vadd.f32 1.0, %v1851_v1  ;;  %1719 = vmatprep.mubr.msk.bf16.mxu1 %vm229_vm0, %v943_v59  ;;  %v1784_v55 = vld [vmem:[%s2673_s13 + $0x20] sm:$0xff]   ;;  %v1786_v59 = vld [vmem:[%s2673_s13 + $0x30] sm:$0xff]   ;;  %v1787_v1 = vld [vmem:[%s2673_s13 + $0x38] sm:$0xff]  }
 0x609   :  { %v934_v40 = vmul.f32 0.5, %v926_v47  ;;  %1720 = vmatmul.mubr.msk.bf16.vlgmr.msra.gmra.mxu1 %vm229_vm0, %v944_v60  ;;  %v939_v45 = vmul.f32 %v931_v35, %v2442_v44  ;;  %v1208_v60 = vpop.permute.xlu1 %1207 }
 0x60a   :  { %v932_v32 = vmul.f32 0.5, %v924_v51  ;;  %v1116_v51 = vld [vmem:[%s2672_s11] sm:$0x1] }
 0x60b   :  { %v942_v20 = vmul.f32 %v934_v40, %v868_v53 }
 0x60c   :  { %v940_v28 = vmul.f32 %v932_v32, %v860_v21 }
 0x60d   :  { %v946_v7 = vpack.c.bf16 %v942_v20, %v941_v2  ;;  %v1218_v47 = vpop.permute.xlu1 %1217  ;;  %v2537_v2 = vld [vmem:[#allocation2] ss:$0 sm:$0xff] }
 0x60e   :  { %v945_v5 = vpack.c.bf16 %v940_v28, %v939_v45 }
 0x610   :  { %1723 = vmatprep.mubr.msk.bf16.mxu1 %vm229_vm0, %v945_v5 }
 0x611   :  { %1724 = vmatmul.mubr.msk.bf16.gmra.mxu1 %vm229_vm0, %v946_v7  ;;  %v1223_v35 = vpop.permute.xlu1 %1222 }
 0x612   :  { %1735 = vmatprep.mubr.msk.bf16.mxu1 %vm1914_vm2, %v1913_v61 }
 0x615   :  { %v1233_v0 = vpop.permute.xlu1 %1232 }
 0x619   :  { %v1243_v40 = vpop.permute.xlu1 %1242 }
 0x61d   :  { %v2529_v32 = vpop.permute.xlu1 %1252 }
 0x621   :  { %v2531_v20 = vpop.permute.xlu1 %1262 }
 0x625   :  { %v2533_v45 = vpop.permute.xlu1 %1272 }
 0x629   :  { %v2535_v28 = vpop.permute.xlu1 %1282 }
 0x6c9   :  { %v1721_v44 = vpop.f32.mrf.mxu1 }
 0x6ca   :  { %v1019_v53 = vadd.f32 %v1721_v44, %v1588_v39 }
 0x6cb   :  { %v1010_v21 = vpop.f32.mrf.mxu1 }
 0x6cc   :  { %v1043_v12 = vadd.f32 %v1019_v53, %v2257_v25  ;;  %v1011_v9 = vadd.f32 %v1588_v39, %v1010_v21 }
 0x6cd   :  { %v1722_v13 = vpop.f32.mrf.mxu1 }
 0x6ce   :  { %v1041_v33 = vadd.f32 %v1011_v9, %v2254_v31  ;;  %v1022_v3 = vadd.f32 %v1722_v13, %v1588_v39  ;;  %v2475_v17 = vmul.f32 %v1594_v11, %v1043_v12 }
 0x6cf   :  { %v1013_v18 = vpop.f32.mrf.mxu1 }
 0x6d0   :  { %v1044_v19 = vadd.f32 %v1022_v3, %v2265_v57  ;;  %v1014_v23 = vadd.f32 %v1588_v39, %v1013_v18  ;;  %v1060_v26 = vmul.f32 %v1594_v11, %v1041_v33 }
 0x6d1   :  { %v1725_v63 = vpop.f32.mrf.mxu1 }
 0x6d2   :  { %v1042_v15 = vadd.f32 %v1014_v23, %v2262_v56  ;;  %v1035_v52 = vadd.f32 %v1725_v63, %v1588_v39  ;;  %v1068_v27 = vsel %vm229_vm0, %v1060_v26, 0.0  ;;  %v1063_v29 = vmul.f32 %v1594_v11, %v1044_v19  ;;  %v1852_v23 = vld [vmem:[%s2683_s0] sm:$0xff] }
 0x6d3   :  { %1069 = vadd.xlane.f32.xlu1 %v1068_v27  ;;  %v1026_v25 = vpop.f32.mrf.mxu1 }
 0x6d4   :  { %v1047_v30 = vadd.f32 %v1035_v52, %v2277_v62  ;;  %v1027_v31 = vadd.f32 %v1588_v39, %v1026_v25  ;;  %v2481_v37 = vmul.f32 %v1594_v11, %v1042_v15  ;;  %v1077_v8 = vsel %vm229_vm0, %v1063_v29, 0.0  ;;  %v1853_v52 = vld [vmem:[%s2683_s0 + $0x10] sm:$0xff] }
 0x6d5   :  { %v1726_v36 = vpop.f32.mrf.mxu1  ;;  %v1049_v43 = vpack.c.bf16 %v1042_v15, %v1041_v33 }
 0x6d6   :  { %v1045_v38 = vadd.f32 %v1027_v31, %v2272_v42  ;;  %v1038_v57 = vadd.f32 %v1726_v36, %v1588_v39  ;;  %v2485_v4 = vmul.f32 %v1594_v11, %v1047_v30  ;;  %v1854_v36 = vld [vmem:[%s2683_s0 + $0x18] sm:$0xff] }
 0x6d7   :  { %1078 = vadd.xlane.f32.xlu1 %v1077_v8  ;;  %v1029_v56 = vpop.f32.mrf.mxu1 }
 0x6d8   :  { %v1048_v41 = vadd.f32 %v1038_v57, %v2285_v58  ;;  %v1030_v14 = vadd.f32 %v1588_v39, %v1029_v56  ;;  %v2488_v16 = vmul.f32 %v1594_v11, %v1045_v38  ;;  %v1050_v58 = vpack.c.bf16 %v1044_v19, %v1043_v12  ;;  %v1855_v57 = vld [vmem:[%s2683_s0 + $0x8] sm:$0xff] }
 0x6da   :  { %v1052_v46 = vpack.c.bf16 %v1048_v41, %v1047_v30  ;;  %v1046_v62 = vadd.f32 %v1030_v14, %v2282_v6  ;;  %v1067_v50 = vmul.f32 %v1594_v11, %v1048_v41 }
 0x6dc   :  { %1728 = vmatpush3.bf16.msra.mxu1 %v1052_v46  ;;  %1739 = vmatprep.subr.bf16.mxu0 %v1052_v46  ;;  %v1051_v48 = vpack.c.bf16 %v1046_v62, %v1045_v38  ;;  %v1065_v49 = vmul.f32 %v1594_v11, %v1046_v62  ;;  %v1089_v6 = vsel %vm229_vm0, %v1067_v50, 0.0  ;;  %v1213_v11 = vpop.permute.xlu0 %1212 }
 0x6dd   :  { %1740 = vmatpush3.bf16.msra.mxu0 %v1052_v46  ;;  %1729 = vmatprep.subr.bf16.mxu1 %v1913_v61 }
 0x6de   :  { %1741 = vmatprep.subr.bf16.mxu0 %v1051_v48  ;;  %v1083_v42 = vsel %vm229_vm0, %v1065_v49, 0.0 }
 0x6df   :  { %1084 = vadd.xlane.f32.xlu1 %v1083_v42 }
 0x6e0   :  { %1730 = vmatpush3.bf16.msra.mxu1 %v1051_v48  ;;  %v1228_v12 = vpop.permute.xlu0 %1227 }
 0x6e1   :  { %1742 = vmatpush3.bf16.msra.mxu0 %v1051_v48  ;;  %1731 = vmatprep.subr.bf16.mxu1 %v1913_v61 }
 0x6e2   :  { %1743 = vmatprep.subr.bf16.mxu0 %v1050_v58 }
 0x6e3   :  { %1090 = vadd.xlane.f32.xlu1 %v1089_v6 }
 0x6e4   :  { %1732 = vmatpush3.bf16.msra.mxu1 %v1050_v58  ;;  %v1238_v13 = vpop.permute.xlu0 %1237 }
 0x6e5   :  { %1744 = vmatpush3.bf16.msra.mxu0 %v1050_v58  ;;  %1733 = vmatprep.subr.bf16.mxu1 %v1913_v61  ;;  %v1856_v58 = vld [vmem:[%s2683_s0 + $0x20] sm:$0xff] }
 0x6e6   :  { %1745 = vmatprep.subr.bf16.mxu0 %v1049_v43 }
 0x6e8   :  { %1734 = vmatpush3.bf16.msra.mxu1 %v1049_v43  ;;  %v1248_v25 = vpop.permute.xlu0 %1247 }
 0x6e9   :  { %1746 = vmatpush3.bf16.msra.mxu0 %v1049_v43 }
 0x6eb   :  { %1736 = vmatmul.mubr.msk.bf16.vlgmr.msra.gmra.mxu1 %vm1127_vm1, %v1116_v51 }
 0x6ec   :  { %1748 = vmatmul.mubr.msk.bf16.vlgmr.msra.gmra.mxu0 %vm1127_vm1, %v1781_v22  ;;  %v1258_v22 = vpop.permute.xlu0 %1257 }
 0x6ed   :  { %1751 = vmatprep.mubr.msk.bf16.mxu0 %vm1127_vm1, %v1782_v54 }
 0x6f4   :  { %1752 = vmatmul.mubr.msk.bf16.gmra.mxu0 %vm1127_vm1, %v1783_v24 }
 0x6f5   :  { %1755 = vmatprep.mubr.msk.bf16.mxu0 %vm1127_vm1, %v1784_v55 }
 0x6fc   :  { %1756 = vmatmul.mubr.msk.bf16.gmra.mxu0 %vm1127_vm1, %v1785_v34  ;;  %v1857_v34 = vld [vmem:[%s2683_s0 + $0x30] sm:$0xff] }
 0x6fd   :  { %1759 = vmatprep.mubr.msk.bf16.mxu0 %vm1127_vm1, %v1786_v59 }
 0x704   :  { %1760 = vmatmul.mubr.msk.bf16.gmra.mxu0 %vm1127_vm1, %v1787_v1 }
 0x75c   :  { %v1070_v5 = vpop.xlane.xlu1 %1069 }
 0x75d   :  { %v1099_v7 = vadd.f32 %v2537_v2, %v1070_v5 }
 0x75f   :  { %1108 = vst.msk [vmem:[%s2676_s16] sm:$0xff] %vm1107_vm3, %v1099_v7  ;;  %v1859_v7 = vld [vmem:[%s2683_s0 + $0x28] sm:$0xff] }
 0x760   :  { %v1079_v61 = vpop.xlane.xlu1 %1078 }
 0x761   :  { %v1102_v10 = vadd.f32 %v2537_v2, %v1079_v61 }
 0x763   :  { %1111 = vst.msk [vmem:[%s2676_s16 + $0x18] sm:$0xff] %vm1107_vm3, %v1102_v10 }
 0x768   :  { %v1085_v39 = vpop.xlane.xlu1 %1084 }
 0x769   :  { %v1104_v44 = vadd.f32 %v2537_v2, %v1085_v39 }
 0x76b   :  { %1113 = vst.msk [vmem:[%s2676_s16 + $0x28] sm:$0xff] %vm1107_vm3, %v1104_v44 }
 0x76c   :  { %v1091_v53 = vpop.xlane.xlu1 %1090 }
 0x76d   :  { %v1106_v21 = vadd.f32 %v2537_v2, %v1091_v53 }
 0x76f   :  { %1115 = vst.msk [vmem:[%s2676_s16 + $0x38] sm:$0xff] %vm1107_vm3, %v1106_v21 }
 0x7ac   :  { %v1749_v9 = vpop.f32.mrf.mxu0 }
 0x7ad   :  { %v1392_v3 = vadd.f32 %v1749_v9, %v1218_v47 }
 0x7ae   :  { %v1383_v33 = vpop.f32.mrf.mxu0 }
 0x7af   :  { %v1384_v18 = vadd.f32 %v1383_v33, %v1208_v60  ;;  %v1448_v27 = vsub.f32 %v1853_v52, %v1392_v3 }
 0x7b0   :  { %v1750_v19 = vpop.f32.mrf.mxu0 }
 0x7b1   :  { %v1446_v26 = vsub.f32 %v1852_v23, %v1384_v18  ;;  %v1395_v63 = vadd.f32 %v1750_v19, %v1223_v35  ;;  %v1464_v41 = vand.u32 2147483647, %v1448_v27  ;;  %v1860_v18 = vld [vmem:[%s2683_s0 + $0x40] sm:$0xff] }
 0x7b2   :  { %v1386_v15 = vpop.f32.mrf.mxu0 }
 0x7b3   :  { %v1387_v29 = vadd.f32 %v1386_v15, %v1213_v11  ;;  %v1462_v30 = vand.u32 2147483647, %v1446_v26  ;;  %v1449_v38 = vsub.f32 %v1854_v36, %v1395_v63  ;;  %v1481_v55 = vsel %vm229_vm0, %v1464_v41, 0.0  ;;  %v1861_v63 = vld [vmem:[%s2683_s0 + $0x50] sm:$0xff] }
 0x7b4   :  { %v1753_v31 = vpop.f32.mrf.mxu0 }
 0x7b5   :  { %v1447_v8 = vsub.f32 %v1855_v57, %v1387_v29  ;;  %v1408_v46 = vadd.f32 %v1753_v31, %v1238_v13  ;;  %v1478_v48 = vsel %vm229_vm0, %v1462_v30, 0.0  ;;  %v1465_v42 = vand.u32 2147483647, %v1449_v38  ;;  %v1863_v57 = vld [vmem:[%s2683_s0 + $0x48] sm:$0xff] }
 0x7b6   :  { %v1399_v56 = vpop.f32.mrf.mxu0 }
 0x7b7   :  { %v1463_v14 = vand.u32 2147483647, %v1447_v8  ;;  %v1400_v62 = vadd.f32 %v1399_v56, %v1228_v12  ;;  %v1452_v59 = vsub.f32 %v1857_v34, %v1408_v46  ;;  %v1483_v51 = vsel %vm229_vm0, %v1465_v42, 0.0  ;;  %v1268_v12 = vpop.permute.xlu0 %1267 }
 0x7b8   :  { %v1754_v49 = vpop.f32.mrf.mxu0 }
 0x7b9   :  { %v1479_v50 = vsel %vm229_vm0, %v1463_v14, 0.0  ;;  %v1450_v6 = vsub.f32 %v1856_v58, %v1400_v62  ;;  %v1411_v43 = vadd.f32 %v1754_v49, %v1243_v40  ;;  %v1858_v40 = vld [vmem:[%s2683_s0 + $0x38] sm:$0xff]  ;;  %v1468_v53 = vand.u32 2147483647, %v1452_v59  ;;  %v1865_v59 = vld [vmem:[%s2683_s0 + $0x70] sm:$0xff] }
 0x7ba   :  { %v1480_v54 = vadd.f32 %v1479_v50, %v1478_v48  ;;  %v1402_v24 = vpop.f32.mrf.mxu0 }
 0x7bb   :  { %v1466_v1 = vand.u32 2147483647, %v1450_v6  ;;  %v1403_v60 = vadd.f32 %v1402_v24, %v1233_v0  ;;  %v1453_v5 = vsub.f32 %v1858_v40, %v1411_v43  ;;  %v1489_v27 = vsel %vm229_vm0, %v1468_v53, 0.0  ;;  %v1278_v56 = vpop.permute.xlu0 %1277  ;;  %v1864_v43 = vld [vmem:[%s2683_s0 + $0x60] sm:$0xff]  ;;  %v1866_v40 = vld [vmem:[%s2683_s0 + $0x78] sm:$0xff] }
 0x7bc   :  { %v1482_v47 = vadd.f32 %v1481_v55, %v1480_v54  ;;  %v1757_v35 = vpop.f32.mrf.mxu0 }
 0x7bd   :  { %v1451_v61 = vsub.f32 %v1859_v7, %v1403_v60  ;;  %v1424_v39 = vadd.f32 %v1757_v35, %v1258_v22  ;;  %v1485_v0 = vsel %vm229_vm0, %v1466_v1, 0.0  ;;  %v1469_v33 = vand.u32 2147483647, %v1453_v5  ;;  %v1867_v5 = vld [vmem:[%s2683_s0 + $0x68] sm:$0xff] }
 0x7be   :  { %v1484_v10 = vadd.f32 %v1483_v51, %v1482_v47  ;;  %v1415_v44 = vpop.f32.mrf.mxu0 }
 0x7bf   :  { %v1467_v21 = vand.u32 2147483647, %v1451_v61  ;;  %v1416_v11 = vadd.f32 %v1415_v44, %v1248_v25  ;;  %v1456_v15 = vsub.f32 %v1861_v63, %v1424_v39  ;;  %v1491_v36 = vsel %vm229_vm0, %v1469_v33, 0.0 }
 0x7c0   :  { %v1486_v9 = vadd.f32 %v1485_v0, %v1484_v10  ;;  %v1758_v13 = vpop.f32.mrf.mxu0  ;;  %v1071_v33 = vsel %vm229_vm0, %v2481_v37, 0.0 }
 0x7c1   :  { %v1487_v3 = vsel %vm229_vm0, %v1467_v21, 0.0  ;;  %v1454_v19 = vsub.f32 %v1860_v18, %v1416_v11  ;;  %v1427_v23 = vadd.f32 %v1758_v13, %v2531_v20  ;;  %v1862_v20 = vld [vmem:[%s2683_s0 + $0x58] sm:$0xff]  ;;  %v1472_v41 = vand.u32 2147483647, %v1456_v15 }
 0x7c2   :  { %v1488_v26 = vadd.f32 %v1487_v3, %v1486_v9  ;;  %v1418_v52 = vpop.f32.mrf.mxu0  ;;  %v1074_v3 = vsel %vm229_vm0, %v2475_v17, 0.0  ;;  %v1080_v18 = vsel %vm229_vm0, %v2488_v16, 0.0 }
 0x7c3   :  { %v1470_v29 = vand.u32 2147483647, %v1454_v19  ;;  %v1419_v25 = vadd.f32 %v1418_v52, %v2529_v32  ;;  %v1457_v38 = vsub.f32 %v1862_v20, %v1427_v23  ;;  %v1497_v34 = vsel %vm229_vm0, %v1472_v41, 0.0  ;;  %v1165_v23 = vpop.f32.mrf.mxu1 }
 0x7c4   :  { %v1490_v30 = vadd.f32 %v1489_v27, %v1488_v26  ;;  %v1761_v31 = vpop.f32.mrf.mxu0  ;;  %v1086_v19 = vsel %vm229_vm0, %v2485_v4, 0.0  ;;  %v1596_v26 = vld [vmem:[#allocation3] ss:$0 sm:$0xff] }
 0x7c5   :  { %v1455_v8 = vsub.f32 %v1863_v57, %v1419_v25  ;;  %v1493_v32 = vsel %vm229_vm0, %v1470_v29, 0.0  ;;  %v1440_v48 = vadd.f32 %v1761_v31, %v1278_v56  ;;  %v1473_v58 = vand.u32 2147483647, %v1457_v38  ;;  %v1737_v63 = vpop.f32.mrf.mxu1 }
 0x7c6   :  { %v1492_v14 = vadd.f32 %v1491_v36, %v1490_v30  ;;  %v1431_v46 = vpop.f32.mrf.mxu0 }
 0x7c7   :  { %v1471_v62 = vand.u32 2147483647, %v1455_v8  ;;  %v1432_v49 = vadd.f32 %v1431_v46, %v1268_v12  ;;  %v1460_v1 = vsub.f32 %v1865_v59, %v1440_v48  ;;  %v1499_v51 = vsel %vm229_vm0, %v1473_v58, 0.0  ;;  %v1168_v15 = vpop.f32.mrf.mxu1 }
 0x7c8   :  { %v1494_v42 = vadd.f32 %v1493_v32, %v1492_v14  ;;  %v1762_v50 = vpop.f32.mrf.mxu0 }
 0x7c9   :  { %v1495_v6 = vsel %vm229_vm0, %v1471_v62, 0.0  ;;  %v1458_v22 = vsub.f32 %v1864_v43, %v1432_v49  ;;  %v1443_v54 = vadd.f32 %v1762_v50, %v2535_v28  ;;  %v1476_v10 = vand.u32 2147483647, %v1460_v1  ;;  %v1738_v52 = vpop.f32.mrf.mxu1 }
 0x7ca   :  { %v1496_v24 = vadd.f32 %v1495_v6, %v1494_v42  ;;  %v1434_v55 = vpop.f32.mrf.mxu0 }
 0x7cb   :  { %v1474_v60 = vand.u32 2147483647, %v1458_v22  ;;  %v1435_v47 = vadd.f32 %v1434_v55, %v2533_v45  ;;  %v1461_v28 = vsub.f32 %v1866_v40, %v1443_v54  ;;  %v1505_v11 = vsel %vm229_vm0, %v1476_v10, 0.0 }
 0x7cc   :  { %v1498_v35 = vadd.f32 %v1497_v34, %v1496_v24 }
 0x7cd   :  { %v1459_v7 = vsub.f32 %v1867_v5, %v1435_v47  ;;  %v1501_v39 = vsel %vm229_vm0, %v1474_v60, 0.0  ;;  %v1477_v45 = vand.u32 2147483647, %v1461_v28 }
 0x7ce   :  { %v1500_v61 = vadd.f32 %v1499_v51, %v1498_v35 }
 0x7cf   :  { %v1475_v44 = vand.u32 2147483647, %v1459_v7  ;;  %v1507_v9 = vsel %vm229_vm0, %v1477_v45, 0.0 }
 0x7d0   :  { %v1502_v53 = vadd.f32 %v1501_v39, %v1500_v61 }
 0x7d1   :  { %v1503_v0 = vsel %vm229_vm0, %v1475_v44, 0.0 }
 0x7d2   :  { %v1504_v21 = vadd.f32 %v1503_v0, %v1502_v53 }
 0x7d4   :  { %v1506_v12 = vadd.f32 %v1505_v11, %v1504_v21 }
 0x7d6   :  { %v1508_v13 = vadd.f32 %v1507_v9, %v1506_v12 }
 0x7d8   :  { %1509 = vadd.xlane.f32.xlu0 %v1508_v13 }
 0x7dc   :  { %1072 = vadd.xlane.f32.xlu0 %v1071_v33 }
 0x7e0   :  { %1075 = vadd.xlane.f32.xlu0 %v1074_v3 }
 0x7e4   :  { %1081 = vadd.xlane.f32.xlu0 %v1080_v18 }
 0x7e8   :  { %1087 = vadd.xlane.f32.xlu0 %v1086_v19 }
 0x7fe   :  { %1124 = vperm.xlu0 %1770, %v1596_v26  }
 0x861   :  { %v1510_v37 = vpop.xlane.xlu0 %1509 }
 0x862   :  { %v1511_v27 = vrot.slane %v1510_v37, 4 }
 0x864   :  { %v1512_v29 = vadd.f32 %v1511_v27, %v1510_v37 }
 0x865   :  { %v1073_v25 = vpop.xlane.xlu0 %1072 }
 0x866   :  { %v1513_v17 = vrot.slane %v1512_v29, 2  ;;  %v1100_v30 = vadd.f32 %v2537_v2, %v1073_v25 }
 0x868   :  { %1109 = vst.msk [vmem:[%s2676_s16 + $0x8] sm:$0xff] %vm1107_vm3, %v1100_v30  ;;  %v1514_v4 = vadd.f32 %v1513_v17, %v1512_v29 }
 0x869   :  { %v1076_v16 = vpop.xlane.xlu0 %1075 }
 0x86a   :  { %v1101_v31 = vadd.f32 %v2537_v2, %v1076_v16  ;;  %v1515_v36 = vrot.slane %v1514_v4, 1 }
 0x86c   :  { %1110 = vst.msk [vmem:[%s2676_s16 + $0x10] sm:$0xff] %vm1107_vm3, %v1101_v31  ;;  %v1516_v20 = vadd.f32 %v1515_v36, %v1514_v4 }
 0x86d   :  { %v1082_v38 = vpop.xlane.xlu0 %1081 }
 0x86e   :  { %v1103_v57 = vadd.f32 %v2537_v2, %v1082_v38  ;;  %1763 = vpush %v1516_v20 }
 0x870   :  { %1112 = vst.msk [vmem:[%s2676_s16 + $0x20] sm:$0xff] %vm1107_vm3, %v1103_v57 }
 0x871   :  { %v1088_v8 = vpop.xlane.xlu0 %1087 }
 0x872   :  { %v1105_v56 = vadd.f32 %v2537_v2, %v1088_v8 }
 0x874   :  { %1114 = vst.msk [vmem:[%s2676_s16 + $0x30] sm:$0xff] %vm1107_vm3, %v1105_v56 }
 0x879   :  { %v1125_v41 = vpop.permute.xlu0 %1124 }
 0x87a   :  { %v1166_v14 = vadd.f32 %v1165_v23, %v1125_v41 }
 0x87c   :  { %1172 = vst.msk [vmem:[#allocation4] sm:$0x3] %vm1171_vm4, %v1166_v14 }
 0x87d   :  { %1879 = shalt.err (!%p1876_p4)
}
 0x87e   :  { %1531 = dma.vmem_to_hbm [thread:$0]  %s1529_s19, 32, %s2675_s15, [#allocation5]   ;;  %vm1520_vm5 = vcmask 0  }
 0x87f   :  { %s1916_s10 = smov [#allocation6]  }
 0x880   :  { %s1540_s16 = sshll.u32 %s1916_s10, 4  ;;  %s1541_s16 = int_to_ptr.vmem [resolvable:$true] %s1540_s16 }
 0x881   :  { %s1888_s13 = scalar_lea.vmem %s1541_s16, 16  ;;  %s1892_s4 = scalar_lea.vmem %s1541_s16, 32 }
 0x882   :  { %p1889_p5 = scmp.ne.s32.totalorder %s1541_s16, %s1888_s13  ;;  %p1893_p6 = scmp.lt.s32.totalorder %s1541_s16, %s1541_s16 }
 0x883   :  { %p1894_p7 = scmp.lt.s32.totalorder %s1892_s4, %s1888_s13 }
 0x885   :  { %p1895_p8 = por %p1894_p7, %p1893_p6 }
 0x887   :  { %p1896_p9 = pnand %p1895_p8, %p1889_p5 }
 0x89f   :  { %s1764_s3 = spop %1763 }
 0x8a0   :  { %s1518_s11 = smul.f32 0.00048828125, %s1764_s3 }
 0x8a2   :  { %v1519_v2 = vstv %s1518_s11 }
 0x8a3   :  { %1521 = vst.msk [vmem:[#allocation6] sm:$0x1] %vm1520_vm5, %v1519_v2 }
 0x8a4   :  { %1899 = shalt.err (!%p1896_p9)
}
 0x8a5   :  { %1543 = dma.vmem_to_hbm [thread:$0]  %s1541_s16, 16, %s2677_s17, [#allocation7]  }
 0x8a6   :  { %1908 = dma.done.wait [#allocation5], 32  }
 0x8a7   :  { %1909 = vsyncadd [#allocation5], 4294967264 }
 0x8a8   :  { %1910 = dma.done.wait [#allocation7], 16  }
 0x8a9   :  { %1911 = vsyncadd [#allocation7], 4294967280 }
 0x8aa   :  { %1552 = vsyncpa [#allocation5], 1 }
 0x8ab   :  { %1553 = vsyncpa [#allocation7], 1 }

</bundles_post_ra>
